<compile_context>
chip_gen: v7x
topology: tpu7x:2x2x1
jax: 0.10.0
libtpu: 0.0.40
codegen_flags: <defaults>
</compile_context>

<pallas_src>
import jax
import jax.numpy as jnp
from jax import lax
from jax.experimental import pallas as pl
from jax.experimental.pallas import tpu as pltpu

EPS = 1e-5


# ----------------------------------------------------------------------------
# Host-side (traced-once) helpers: interpolation & banded conv matrices.
# ----------------------------------------------------------------------------
def _interp_matrix(n_in, n_out):
    # align_corners=True bilinear: src = i * (n_in - 1) / (n_out - 1)
    if n_in == 1:
        return jnp.ones((n_out, 1), jnp.float32)
    src = jnp.arange(n_out, dtype=jnp.float32) * (n_in - 1) / (n_out - 1)
    i0 = jnp.clip(jnp.floor(src).astype(jnp.int32), 0, n_in - 2)
    i1 = i0 + 1
    w1 = src - i0.astype(jnp.float32)
    w0 = 1.0 - w1
    return (jax.nn.one_hot(i0, n_in, dtype=jnp.float32) * w0[:, None]
            + jax.nn.one_hot(i1, n_in, dtype=jnp.float32) * w1[:, None])


def _band_mats(w_hwio, W):
    """(3,3,Cin,Cout) conv weights -> (3, W*Cin, W*Cout) banded tap matrices.

    With activations flattened lane-dense as x[i, w*Cin + c], one conv row-tap
    dy becomes a single matmul  acc += x_row[i+dy-1, :] @ M_dy  where M_dy is a
    block-banded matrix encoding the three dx taps; out-of-image columns are
    simply absent, which reproduces PyTorch's zero padding along W.
    """
    mats = []
    for dy in range(3):
        m = None
        for dx in range(3):
            blk = jnp.kron(jnp.eye(W, k=1 - dx, dtype=jnp.float32),
                           w_hwio[dy, dx].astype(jnp.float32))
            m = blk if m is None else m + blk
        mats.append(m)
    return jnp.stack(mats, axis=0)


# ----------------------------------------------------------------------------
# In-kernel helpers.
# ----------------------------------------------------------------------------
def _banded_conv(x, m_ref):
    # x: (H, W*Cin) flat activation; m_ref: (3, W*Cin, W*Cout) banded taps.
    # Row halo (padding along H) is handled here with a zero top/bottom row;
    # the column halo is already folded into the banded matrices. The
    # accumulator is only ~2 vregs at these tile sizes, so it stays in
    # registers (no VMEM scratch needed).
    H = x.shape[0]
    zero_row = jnp.zeros((1, x.shape[1]), x.dtype)
    xp = jnp.concatenate([zero_row, x, zero_row], axis=0)          # (H+2, W*Cin)
    acc = jnp.dot(xp[0:H], m_ref[0], preferred_element_type=jnp.float32)
    acc = acc + jnp.dot(xp[1:H + 1], m_ref[1], preferred_element_type=jnp.float32)
    acc = acc + jnp.dot(xp[2:H + 2], m_ref[2], preferred_element_type=jnp.float32)
    return acc


def _stats_rows(y):
    # Per-lane sum and sum-of-squares; per-channel finalisation happens in JAX.
    return jnp.concatenate([jnp.sum(y, axis=0, keepdims=True),
                            jnp.sum(y * y, axis=0, keepdims=True)], axis=0)


# ----------------------------------------------------------------------------
# Kernel 1: bilinear-upsample(x1) + concat([x2, up], C) + conv1 + bias1,
#           emitting BN1 batch statistics. One HBM pass for the whole stage.
# ----------------------------------------------------------------------------
def _up_concat_conv_kernel(x2_ref, x1_ref, bw_ref, ah_ref, ma_ref, mb_ref,
                           b1_ref, y_ref, st_ref):
    # Separable align_corners bilinear x2: (H1, W1*C1) -> (H, W*C1).
    tmp = jnp.dot(x1_ref[0], bw_ref[...], preferred_element_type=jnp.float32)
    up = jnp.dot(ah_ref[...], tmp, preferred_element_type=jnp.float32)
    # conv1(concat([x2, up], C)) == conv(x2, w1[:,:, :C2]) + conv(up, w1[:,:, C2:])
    y = (_banded_conv(x2_ref[0], ma_ref)
         + _banded_conv(up, mb_ref)
         + b1_ref[...])
    y_ref[0] = y
    st_ref[0] = _stats_rows(y)


# ----------------------------------------------------------------------------
# Kernel 2: BN1-affine + ReLU + conv2 + bias2, emitting BN2 batch statistics.
# ----------------------------------------------------------------------------
def _bn_relu_conv_kernel(y1_ref, sc_ref, sh_ref, m2_ref, b2_ref, y_ref, st_ref):
    z = jnp.maximum(y1_ref[0] * sc_ref[...] + sh_ref[...], 0.0)
    y = _banded_conv(z, m2_ref) + b2_ref[...]
    y_ref[0] = y
    st_ref[0] = _stats_rows(y)


# ----------------------------------------------------------------------------
# Kernel 3: final BN2-affine + ReLU epilogue (pure VPU, lane-dense).
# ----------------------------------------------------------------------------
def _affine_relu_kernel(y_ref, sc_ref, sh_ref, o_ref):
    o_ref[0] = jnp.maximum(y_ref[0] * sc_ref[...] + sh_ref[...], 0.0)


# ----------------------------------------------------------------------------
# Wrapper.
# ----------------------------------------------------------------------------
def _bn_scale_shift_rows(stats, gamma, beta, count, W):
    # stats: (N, 2, W*C) per-image sums -> lane-dense (1, W*C) scale/shift rows
    # implementing training-mode BatchNorm (biased variance).
    C = gamma.shape[0]
    s = jnp.sum(stats, axis=0).reshape(2, W, C).sum(axis=1)        # (2, C)
    mean = s[0] / count
    var = s[1] / count - mean * mean
    scale = gamma / jnp.sqrt(var + EPS)
    shift = beta - mean * scale
    return jnp.tile(scale, W)[None, :], jnp.tile(shift, W)[None, :]


def _parallel(n):
    return pltpu.CompilerParams(dimension_semantics=("parallel",) * n)


@jax.jit
def upconv_forward(x1_nchw, x2_nchw, params):
    # The PyTorch boundary is NCHW; one transpose in / one transpose out, then
    # every Pallas kernel works on the lane-dense flat layout (N, H, W*C).
    x1 = jnp.transpose(x1_nchw, (0, 2, 3, 1)).astype(jnp.float32)
    x2 = jnp.transpose(x2_nchw, (0, 2, 3, 1)).astype(jnp.float32)
    N, H1, W1, C1 = x1.shape
    _, H, W, C2 = x2.shape
    assert H == 2 * H1 and W == 2 * W1, "UpConv needs x2 at 2x the x1 resolution"
    Cout = params["w1"].shape[-1]
    count = float(N * H * W)

    x1f = x1.reshape(N, H1, W1 * C1)
    x2f = x2.reshape(N, H, W * C2)

    # Tiny constant operands (a few KB each), built once per trace.
    Ah = _interp_matrix(H1, H)                                     # (H, H1)
    Aw = _interp_matrix(W1, W)                                     # (W, W1)
    Bw = jnp.kron(Aw.T, jnp.eye(C1, dtype=jnp.float32))            # (W1*C1, W*C1)
    MA = _band_mats(params["w1"][:, :, :C2, :], W)                 # (3, W*C2, W*Cout)
    MB = _band_mats(params["w1"][:, :, C2:, :], W)                 # (3, W*C1, W*Cout)
    M2 = _band_mats(params["w2"], W)                               # (3, W*Cout, W*Cout)
    b1row = jnp.tile(params["b1"], W)[None, :]                     # (1, W*Cout)
    b2row = jnp.tile(params["b2"], W)[None, :]

    # Stage 1: upsample + concat + conv1 (+ BN1 stats), one HBM pass.
    # TODO(synk): for large H/W, add a row-tiled grid axis (2-row halo) and set
    #             vmem_limit_bytes per generation (v7x has only 64 MiB VMEM),
    #             which also gives the 2 v7x TensorCores more parallel steps.
    y1, st1 = pl.pallas_call(
        _up_concat_conv_kernel,
        out_shape=(jax.ShapeDtypeStruct((N, H, W * Cout), jnp.float32),
                   jax.ShapeDtypeStruct((N, 2, W * Cout), jnp.float32)),
        grid=(N,),
        in_specs=[
            pl.BlockSpec((1, H, W * C2), lambda n: (n, 0, 0)),
            pl.BlockSpec((1, H1, W1 * C1), lambda n: (n, 0, 0)),
            pl.BlockSpec((W1 * C1, W * C1), lambda n: (0, 0)),
            pl.BlockSpec((H, H1), lambda n: (0, 0)),
            pl.BlockSpec((3, W * C2, W * Cout), lambda n: (0, 0, 0)),
            pl.BlockSpec((3, W * C1, W * Cout), lambda n: (0, 0, 0)),
            pl.BlockSpec((1, W * Cout), lambda n: (0, 0)),
        ],
        out_specs=(pl.BlockSpec((1, H, W * Cout), lambda n: (n, 0, 0)),
                   pl.BlockSpec((1, 2, W * Cout), lambda n: (n, 0, 0))),
        compiler_params=_parallel(1),
    )(x2f, x1f, Bw, Ah, MA, MB, b1row)

    sc1, sh1 = _bn_scale_shift_rows(st1, params["g1"], params["be1"], count, W)

    # Stage 2: BN1 + ReLU + conv2 (+ BN2 stats), one HBM pass.
    y2, st2 = pl.pallas_call(
        _bn_relu_conv_kernel,
        out_shape=(jax.ShapeDtypeStruct((N, H, W * Cout), jnp.float32),
                   jax.ShapeDtypeStruct((N, 2, W * Cout), jnp.float32)),
        grid=(N,),
        in_specs=[
            pl.BlockSpec((1, H, W * Cout), lambda n: (n, 0, 0)),
            pl.BlockSpec((1, W * Cout), lambda n: (0, 0)),
            pl.BlockSpec((1, W * Cout), lambda n: (0, 0)),
            pl.BlockSpec((3, W * Cout, W * Cout), lambda n: (0, 0, 0)),
            pl.BlockSpec((1, W * Cout), lambda n: (0, 0)),
        ],
        out_specs=(pl.BlockSpec((1, H, W * Cout), lambda n: (n, 0, 0)),
                   pl.BlockSpec((1, 2, W * Cout), lambda n: (n, 0, 0))),
        compiler_params=_parallel(1),
    )(y1, sc1, sh1, M2, b2row)

    sc2, sh2 = _bn_scale_shift_rows(st2, params["g2"], params["be2"], count, W)

    # Stage 3: final BN2 + ReLU.
    out = pl.pallas_call(
        _affine_relu_kernel,
        out_shape=jax.ShapeDtypeStruct((N, H, W * Cout), jnp.float32),
        grid=(N,),
        in_specs=[
            pl.BlockSpec((1, H, W * Cout), lambda n: (n, 0, 0)),
            pl.BlockSpec((1, W * Cout), lambda n: (0, 0)),
            pl.BlockSpec((1, W * Cout), lambda n: (0, 0)),
        ],
        out_specs=pl.BlockSpec((1, H, W * Cout), lambda n: (n, 0, 0)),
        compiler_params=_parallel(1),
    )(y2, sc2, sh2)

    out = out.reshape(N, H, W, Cout)
    return jnp.transpose(out, (0, 3, 1, 2))                        # back to NCHW


# ----------------------------------------------------------------------------
# Pure-JAX reference (PyTorch training-mode semantics) and parameter init.
# ----------------------------------------------------------------------------
def upconv_reference(x1_nchw, x2_nchw, params, eps=EPS):
    x1 = jnp.transpose(x1_nchw, (0, 2, 3, 1)).astype(jnp.float32)
    x2 = jnp.transpose(x2_nchw, (0, 2, 3, 1)).astype(jnp.float32)
    N, H1, W1, C1 = x1.shape
    Ah = _interp_matrix(H1, 2 * H1)
    Aw = _interp_matrix(W1, 2 * W1)
    x1u = jnp.einsum("oh,pw,nhwc->nopc", Ah, Aw, x1)
    x = jnp.concatenate([x2, x1u], axis=-1)

    def conv_bn_relu(z, w, b, gamma, beta):
        y = lax.conv_general_dilated(
            z, w, window_strides=(1, 1), padding="SAME",
            dimension_numbers=("NHWC", "HWIO", "NHWC")) + b
        mean = y.mean(axis=(0, 1, 2))
        var = y.var(axis=(0, 1, 2))
        return jnp.maximum((y - mean) / jnp.sqrt(var + eps) * gamma + beta, 0.0)

    y = conv_bn_relu(x, params["w1"], params["b1"], params["g1"], params["be1"])
    y = conv_bn_relu(y, params["w2"], params["b2"], params["g2"], params["be2"])
    return jnp.transpose(y, (0, 3, 1, 2))


def init_params(key, input_channels, output_channels):
    # Deterministic synthetic init. Conv weights stored HWIO (== PyTorch OIHW
    # weight transposed with (2, 3, 1, 0)).
    k1, k2, k3, k4 = jax.random.split(key, 4)
    s1 = 1.0 / (3.0 * (input_channels ** 0.5))
    s2 = 1.0 / (3.0 * (output_channels ** 0.5))
    return {
        "w1": jax.random.normal(k1, (3, 3, input_channels, output_channels),
                                jnp.float32) * s1,
        "b1": jax.random.normal(k2, (output_channels,), jnp.float32) * 0.1,
        "g1": jnp.ones((output_channels,), jnp.float32),
        "be1": jnp.zeros((output_channels,), jnp.float32),
        "w2": jax.random.normal(k3, (3, 3, output_channels, output_channels),
                                jnp.float32) * s2,
        "b2": jax.random.normal(k4, (output_channels,), jnp.float32) * 0.1,
        "g2": jnp.ones((output_channels,), jnp.float32),
        "be2": jnp.zeros((output_channels,), jnp.float32),
    }


if __name__ == "__main__":
    # input_channels must equal C(x2) + C(x1) for the PyTorch module to be valid.
    input_channels, output_channels = 8, 8
    key = jax.random.PRNGKey(0)
    kx1, kx2, kp = jax.random.split(key, 3)
    x1 = jax.random.normal(kx1, (2, 4, 8, 8), jnp.float32)      # NCHW, low-res
    x2 = jax.random.normal(kx2, (2, 4, 16, 16), jnp.float32)    # NCHW, skip
    params = init_params(kp, input_channels, output_channels)

    out = jax.block_until_ready(upconv_forward(x1, x2, params))
    ref = jax.block_until_ready(upconv_reference(x1, x2, params))

    assert out.shape == (2, output_channels, 16, 16), out.shape
    err = float(jnp.max(jnp.abs(out - ref)))
    assert err < 5e-4, err
    print("KERNEL_OK")
</pallas_src>

<mosaic_0001>
module attributes {stable_mosaic.version = 11 : i64} {
  func.func @_up_concat_conv_kernel(%arg0: i32, %arg1: memref<1x16x64xf32, #tpu.memory_space<vmem>>, %arg2: memref<1x8x32xf32, #tpu.memory_space<vmem>>, %arg3: memref<32x64xf32, #tpu.memory_space<vmem>>, %arg4: memref<16x8xf32, #tpu.memory_space<vmem>>, %arg5: memref<3x64x128xf32, #tpu.memory_space<vmem>>, %arg6: memref<3x64x128xf32, #tpu.memory_space<vmem>>, %arg7: memref<1x128xf32, #tpu.memory_space<vmem>>, %arg8: memref<1x16x128xf32, #tpu.memory_space<vmem>>, %arg9: memref<1x2x128xf32, #tpu.memory_space<vmem>>) attributes {dimension_semantics = [#tpu.dimension_semantics<parallel>], iteration_bounds = array<i64: 2>, scalar_prefetch = 0 : i64, scratch_operands = 0 : i64, tpu.core_type = #tpu.core_type<tc>, window_params = [{transform_indices = @transform_0, window_bounds = array<i64: 1, 16, 64>}, {transform_indices = @transform_1, window_bounds = array<i64: 1, 8, 32>}, {pipeline_mode = #tpu.pipeline_mode<synchronous>, transform_indices = @transform_2, window_bounds = array<i64: 32, 64>}, {pipeline_mode = #tpu.pipeline_mode<synchronous>, transform_indices = @transform_3, window_bounds = array<i64: 16, 8>}, {pipeline_mode = #tpu.pipeline_mode<synchronous>, transform_indices = @transform_4, window_bounds = array<i64: 3, 64, 128>}, {pipeline_mode = #tpu.pipeline_mode<synchronous>, transform_indices = @transform_5, window_bounds = array<i64: 3, 64, 128>}, {pipeline_mode = #tpu.pipeline_mode<synchronous>, transform_indices = @transform_6, window_bounds = array<i64: 1, 128>}, {transform_indices = @transform_7, window_bounds = array<i64: 1, 16, 128>}, {transform_indices = @transform_8, window_bounds = array<i64: 1, 2, 128>}]} {
    %c0 = arith.constant 0 : index
    %c0_0 = arith.constant 0 : index
    %c0_1 = arith.constant 0 : index
    %0 = vector.load %arg2[%c0, %c0_0, %c0_1] : memref<1x8x32xf32, #tpu.memory_space<vmem>>, vector<1x8x32xf32>
    %1 = vector.shape_cast %0 : vector<1x8x32xf32> to vector<8x32xf32>
    %c0_2 = arith.constant 0 : index
    %c0_3 = arith.constant 0 : index
    %2 = vector.load %arg3[%c0_2, %c0_3] : memref<32x64xf32, #tpu.memory_space<vmem>>, vector<32x64xf32>
    %cst = arith.constant dense<0.000000e+00> : vector<8x64xf32>
    %3 = tpu.matmul %1, %2, %cst {dimension_numbers = #tpu.dot_dimension_numbers<[1], [0], [0], [1], [0, 0, 1, 1], [], []>} : vector<8x32xf32>, vector<32x64xf32>, vector<8x64xf32> -> vector<8x64xf32>
    %c0_4 = arith.constant 0 : index
    %c0_5 = arith.constant 0 : index
    %4 = vector.load %arg4[%c0_4, %c0_5] : memref<16x8xf32, #tpu.memory_space<vmem>>, vector<16x8xf32>
    %cst_6 = arith.constant dense<0.000000e+00> : vector<16x64xf32>
    %5 = tpu.matmul %4, %3, %cst_6 {dimension_numbers = #tpu.dot_dimension_numbers<[1], [0], [0], [1], [0, 0, 1, 1], [], []>} : vector<16x8xf32>, vector<8x64xf32>, vector<16x64xf32> -> vector<16x64xf32>
    %c0_7 = arith.constant 0 : index
    %c0_8 = arith.constant 0 : index
    %c0_9 = arith.constant 0 : index
    %6 = vector.load %arg1[%c0_7, %c0_8, %c0_9] : memref<1x16x64xf32, #tpu.memory_space<vmem>>, vector<1x16x64xf32>
    %7 = vector.shape_cast %6 : vector<1x16x64xf32> to vector<16x64xf32>
    %cst_10 = arith.constant 0.000000e+00 : f32
    %8 = vector.broadcast %cst_10 : f32 to vector<1x64xf32>
    %9 = tpu.concatenate %8, %7, %8 in 0 : vector<1x64xf32>, vector<16x64xf32>, vector<1x64xf32> -> vector<18x64xf32>
    %10 = vector.extract_strided_slice %9 {offsets = [0, 0], sizes = [16, 64], strides = [1, 1]} : vector<18x64xf32> to vector<16x64xf32>
    %c0_11 = arith.constant 0 : index
    %c0_12 = arith.constant 0 : index
    %c0_13 = arith.constant 0 : index
    %11 = vector.load %arg5[%c0_11, %c0_12, %c0_13] : memref<3x64x128xf32, #tpu.memory_space<vmem>>, vector<1x64x128xf32>
    %12 = vector.shape_cast %11 : vector<1x64x128xf32> to vector<64x128xf32>
    %cst_14 = arith.constant dense<0.000000e+00> : vector<16x128xf32>
    %13 = tpu.matmul %10, %12, %cst_14 {dimension_numbers = #tpu.dot_dimension_numbers<[1], [0], [0], [1], [0, 0, 1, 1], [], []>} : vector<16x64xf32>, vector<64x128xf32>, vector<16x128xf32> -> vector<16x128xf32>
    %14 = vector.extract_strided_slice %9 {offsets = [1, 0], sizes = [16, 64], strides = [1, 1]} : vector<18x64xf32> to vector<16x64xf32>
    %c1 = arith.constant 1 : index
    %c0_15 = arith.constant 0 : index
    %c0_16 = arith.constant 0 : index
    %15 = vector.load %arg5[%c1, %c0_15, %c0_16] : memref<3x64x128xf32, #tpu.memory_space<vmem>>, vector<1x64x128xf32>
    %16 = vector.shape_cast %15 : vector<1x64x128xf32> to vector<64x128xf32>
    %cst_17 = arith.constant dense<0.000000e+00> : vector<16x128xf32>
    %17 = tpu.matmul %14, %16, %cst_17 {dimension_numbers = #tpu.dot_dimension_numbers<[1], [0], [0], [1], [0, 0, 1, 1], [], []>} : vector<16x64xf32>, vector<64x128xf32>, vector<16x128xf32> -> vector<16x128xf32>
    %18 = arith.addf %13, %17 : vector<16x128xf32>
    %19 = vector.extract_strided_slice %9 {offsets = [2, 0], sizes = [16, 64], strides = [1, 1]} : vector<18x64xf32> to vector<16x64xf32>
    %c2 = arith.constant 2 : index
    %c0_18 = arith.constant 0 : index
    %c0_19 = arith.constant 0 : index
    %20 = vector.load %arg5[%c2, %c0_18, %c0_19] : memref<3x64x128xf32, #tpu.memory_space<vmem>>, vector<1x64x128xf32>
    %21 = vector.shape_cast %20 : vector<1x64x128xf32> to vector<64x128xf32>
    %cst_20 = arith.constant dense<0.000000e+00> : vector<16x128xf32>
    %22 = tpu.matmul %19, %21, %cst_20 {dimension_numbers = #tpu.dot_dimension_numbers<[1], [0], [0], [1], [0, 0, 1, 1], [], []>} : vector<16x64xf32>, vector<64x128xf32>, vector<16x128xf32> -> vector<16x128xf32>
    %23 = arith.addf %18, %22 : vector<16x128xf32>
    %cst_21 = arith.constant 0.000000e+00 : f32
    %24 = vector.broadcast %cst_21 : f32 to vector<1x64xf32>
    %25 = tpu.concatenate %24, %5, %24 in 0 : vector<1x64xf32>, vector<16x64xf32>, vector<1x64xf32> -> vector<18x64xf32>
    %26 = vector.extract_strided_slice %25 {offsets = [0, 0], sizes = [16, 64], strides = [1, 1]} : vector<18x64xf32> to vector<16x64xf32>
    %c0_22 = arith.constant 0 : index
    %c0_23 = arith.constant 0 : index
    %c0_24 = arith.constant 0 : index
    %27 = vector.load %arg6[%c0_22, %c0_23, %c0_24] : memref<3x64x128xf32, #tpu.memory_space<vmem>>, vector<1x64x128xf32>
    %28 = vector.shape_cast %27 : vector<1x64x128xf32> to vector<64x128xf32>
    %cst_25 = arith.constant dense<0.000000e+00> : vector<16x128xf32>
    %29 = tpu.matmul %26, %28, %cst_25 {dimension_numbers = #tpu.dot_dimension_numbers<[1], [0], [0], [1], [0, 0, 1, 1], [], []>} : vector<16x64xf32>, vector<64x128xf32>, vector<16x128xf32> -> vector<16x128xf32>
    %30 = vector.extract_strided_slice %25 {offsets = [1, 0], sizes = [16, 64], strides = [1, 1]} : vector<18x64xf32> to vector<16x64xf32>
    %c1_26 = arith.constant 1 : index
    %c0_27 = arith.constant 0 : index
    %c0_28 = arith.constant 0 : index
    %31 = vector.load %arg6[%c1_26, %c0_27, %c0_28] : memref<3x64x128xf32, #tpu.memory_space<vmem>>, vector<1x64x128xf32>
    %32 = vector.shape_cast %31 : vector<1x64x128xf32> to vector<64x128xf32>
    %cst_29 = arith.constant dense<0.000000e+00> : vector<16x128xf32>
    %33 = tpu.matmul %30, %32, %cst_29 {dimension_numbers = #tpu.dot_dimension_numbers<[1], [0], [0], [1], [0, 0, 1, 1], [], []>} : vector<16x64xf32>, vector<64x128xf32>, vector<16x128xf32> -> vector<16x128xf32>
    %34 = arith.addf %29, %33 : vector<16x128xf32>
    %35 = vector.extract_strided_slice %25 {offsets = [2, 0], sizes = [16, 64], strides = [1, 1]} : vector<18x64xf32> to vector<16x64xf32>
    %c2_30 = arith.constant 2 : index
    %c0_31 = arith.constant 0 : index
    %c0_32 = arith.constant 0 : index
    %36 = vector.load %arg6[%c2_30, %c0_31, %c0_32] : memref<3x64x128xf32, #tpu.memory_space<vmem>>, vector<1x64x128xf32>
    %37 = vector.shape_cast %36 : vector<1x64x128xf32> to vector<64x128xf32>
    %cst_33 = arith.constant dense<0.000000e+00> : vector<16x128xf32>
    %38 = tpu.matmul %35, %37, %cst_33 {dimension_numbers = #tpu.dot_dimension_numbers<[1], [0], [0], [1], [0, 0, 1, 1], [], []>} : vector<16x64xf32>, vector<64x128xf32>, vector<16x128xf32> -> vector<16x128xf32>
    %39 = arith.addf %34, %38 : vector<16x128xf32>
    %40 = arith.addf %23, %39 : vector<16x128xf32>
    %c0_34 = arith.constant 0 : index
    %c0_35 = arith.constant 0 : index
    %41 = vector.load %arg7[%c0_34, %c0_35] : memref<1x128xf32, #tpu.memory_space<vmem>>, vector<1x128xf32>
    %42 = vector.broadcast %41 : vector<1x128xf32> to vector<16x128xf32>
    %43 = arith.addf %40, %42 : vector<16x128xf32>
    %c0_36 = arith.constant 0 : index
    %c0_37 = arith.constant 0 : index
    %c0_38 = arith.constant 0 : index
    %44 = vector.load %arg8[%c0_36, %c0_37, %c0_38] : memref<1x16x128xf32, #tpu.memory_space<vmem>>, vector<1x16x128xf32>
    %45 = vector.shape_cast %44 : vector<1x16x128xf32> to vector<16x128xf32>
    %46 = vector.shape_cast %43 : vector<16x128xf32> to vector<1x16x128xf32>
    tpu.vector_store %arg8[%c0_36, %c0_37, %c0_38], %46 {strides = array<i32>} : memref<1x16x128xf32, #tpu.memory_space<vmem>>, vector<1x16x128xf32>,
    %cst_39 = arith.constant dense<0.000000e+00> : vector<128xf32>
    %47 = vector.multi_reduction <add>, %43, %cst_39 [0] : vector<16x128xf32> to vector<128xf32>
    %48 = vector.shape_cast %47 : vector<128xf32> to vector<1x128xf32>
    %49 = arith.mulf %43, %43 : vector<16x128xf32>
    %cst_40 = arith.constant dense<0.000000e+00> : vector<128xf32>
    %50 = vector.multi_reduction <add>, %49, %cst_40 [0] : vector<16x128xf32> to vector<128xf32>
    %51 = vector.shape_cast %50 : vector<128xf32> to vector<1x128xf32>
    %52 = tpu.concatenate %48, %51 in 0 : vector<1x128xf32>, vector<1x128xf32> -> vector<2x128xf32>
    %c0_41 = arith.constant 0 : index
    %c0_42 = arith.constant 0 : index
    %c0_43 = arith.constant 0 : index
    %53 = vector.load %arg9[%c0_41, %c0_42, %c0_43] : memref<1x2x128xf32, #tpu.memory_space<vmem>>, vector<1x2x128xf32>
    %54 = vector.shape_cast %53 : vector<1x2x128xf32> to vector<2x128xf32>
    %55 = vector.shape_cast %52 : vector<2x128xf32> to vector<1x2x128xf32>
    tpu.vector_store %arg9[%c0_41, %c0_42, %c0_43], %55 {strides = array<i32>} : memref<1x2x128xf32, #tpu.memory_space<vmem>>, vector<1x2x128xf32>,
    return
  }
  func.func @transform_0(%arg0: i32) -> (i32, i32, i32) {
    %c0_i32 = arith.constant 0 : i32
    %c0_i32_0 = arith.constant 0 : i32
    %c0_i32_1 = arith.constant 0 : i32
    return %arg0, %c0_i32, %c0_i32_0 : i32, i32, i32
  }
  func.func @transform_1(%arg0: i32) -> (i32, i32, i32) {
    %c0_i32 = arith.constant 0 : i32
    %c0_i32_0 = arith.constant 0 : i32
    %c0_i32_1 = arith.constant 0 : i32
    return %arg0, %c0_i32, %c0_i32_0 : i32, i32, i32
  }
  func.func @transform_2(%arg0: i32) -> (i32, i32) {
    %c0_i32 = arith.constant 0 : i32
    %c0_i32_0 = arith.constant 0 : i32
    %c0_i32_1 = arith.constant 0 : i32
    return %c0_i32, %c0_i32_0 : i32, i32
  }
  func.func @transform_3(%arg0: i32) -> (i32, i32) {
    %c0_i32 = arith.constant 0 : i32
    %c0_i32_0 = arith.constant 0 : i32
    %c0_i32_1 = arith.constant 0 : i32
    return %c0_i32, %c0_i32_0 : i32, i32
  }
  func.func @transform_4(%arg0: i32) -> (i32, i32, i32) {
    %c0_i32 = arith.constant 0 : i32
    %c0_i32_0 = arith.constant 0 : i32
    %c0_i32_1 = arith.constant 0 : i32
    %c0_i32_2 = arith.constant 0 : i32
    return %c0_i32, %c0_i32_0, %c0_i32_1 : i32, i32, i32
  }
  func.func @transform_5(%arg0: i32) -> (i32, i32, i32) {
    %c0_i32 = arith.constant 0 : i32
    %c0_i32_0 = arith.constant 0 : i32
    %c0_i32_1 = arith.constant 0 : i32
    %c0_i32_2 = arith.constant 0 : i32
    return %c0_i32, %c0_i32_0, %c0_i32_1 : i32, i32, i32
  }
  func.func @transform_6(%arg0: i32) -> (i32, i32) {
    %c0_i32 = arith.constant 0 : i32
    %c0_i32_0 = arith.constant 0 : i32
    %c0_i32_1 = arith.constant 0 : i32
    return %c0_i32, %c0_i32_0 : i32, i32
  }
  func.func @transform_7(%arg0: i32) -> (i32, i32, i32) {
    %c0_i32 = arith.constant 0 : i32
    %c0_i32_0 = arith.constant 0 : i32
    %c0_i32_1 = arith.constant 0 : i32
    return %arg0, %c0_i32, %c0_i32_0 : i32, i32, i32
  }
  func.func @transform_8(%arg0: i32) -> (i32, i32, i32) {
    %c0_i32 = arith.constant 0 : i32
    %c0_i32_0 = arith.constant 0 : i32
    %c0_i32_1 = arith.constant 0 : i32
    return %arg0, %c0_i32, %c0_i32_0 : i32, i32, i32
  }
}

module attributes {stable_mosaic.version = 11 : i64} {
  func.func @_bn_relu_conv_kernel(%arg0: i32, %arg1: memref<1x16x128xf32, #tpu.memory_space<vmem>>, %arg2: memref<1x128xf32, #tpu.memory_space<vmem>>, %arg3: memref<1x128xf32, #tpu.memory_space<vmem>>, %arg4: memref<3x128x128xf32, #tpu.memory_space<vmem>>, %arg5: memref<1x128xf32, #tpu.memory_space<vmem>>, %arg6: memref<1x16x128xf32, #tpu.memory_space<vmem>>, %arg7: memref<1x2x128xf32, #tpu.memory_space<vmem>>) attributes {dimension_semantics = [#tpu.dimension_semantics<parallel>], iteration_bounds = array<i64: 2>, scalar_prefetch = 0 : i64, scratch_operands = 0 : i64, tpu.core_type = #tpu.core_type<tc>, window_params = [{transform_indices = @transform_0, window_bounds = array<i64: 1, 16, 128>}, {pipeline_mode = #tpu.pipeline_mode<synchronous>, transform_indices = @transform_1, window_bounds = array<i64: 1, 128>}, {pipeline_mode = #tpu.pipeline_mode<synchronous>, transform_indices = @transform_2, window_bounds = array<i64: 1, 128>}, {pipeline_mode = #tpu.pipeline_mode<synchronous>, transform_indices = @transform_3, window_bounds = array<i64: 3, 128, 128>}, {pipeline_mode = #tpu.pipeline_mode<synchronous>, transform_indices = @transform_4, window_bounds = array<i64: 1, 128>}, {transform_indices = @transform_5, window_bounds = array<i64: 1, 16, 128>}, {transform_indices = @transform_6, window_bounds = array<i64: 1, 2, 128>}]} {
    %c0 = arith.constant 0 : index
    %c0_0 = arith.constant 0 : index
    %c0_1 = arith.constant 0 : index
    %0 = vector.load %arg1[%c0, %c0_0, %c0_1] : memref<1x16x128xf32, #tpu.memory_space<vmem>>, vector<1x16x128xf32>
    %1 = vector.shape_cast %0 : vector<1x16x128xf32> to vector<16x128xf32>
    %c0_2 = arith.constant 0 : index
    %c0_3 = arith.constant 0 : index
    %2 = vector.load %arg2[%c0_2, %c0_3] : memref<1x128xf32, #tpu.memory_space<vmem>>, vector<1x128xf32>
    %3 = vector.broadcast %2 : vector<1x128xf32> to vector<16x128xf32>
    %4 = arith.mulf %1, %3 : vector<16x128xf32>
    %c0_4 = arith.constant 0 : index
    %c0_5 = arith.constant 0 : index
    %5 = vector.load %arg3[%c0_4, %c0_5] : memref<1x128xf32, #tpu.memory_space<vmem>>, vector<1x128xf32>
    %6 = vector.broadcast %5 : vector<1x128xf32> to vector<16x128xf32>
    %7 = arith.addf %4, %6 : vector<16x128xf32>
    %cst = arith.constant 0.000000e+00 : f32
    %8 = vector.broadcast %cst : f32 to vector<16x128xf32>
    %9 = arith.maximumf %7, %8 : vector<16x128xf32>
    %cst_6 = arith.constant 0.000000e+00 : f32
    %10 = vector.broadcast %cst_6 : f32 to vector<1x128xf32>
    %11 = tpu.concatenate %10, %9, %10 in 0 : vector<1x128xf32>, vector<16x128xf32>, vector<1x128xf32> -> vector<18x128xf32>
    %12 = vector.extract_strided_slice %11 {offsets = [0, 0], sizes = [16, 128], strides = [1, 1]} : vector<18x128xf32> to vector<16x128xf32>
    %c0_7 = arith.constant 0 : index
    %c0_8 = arith.constant 0 : index
    %c0_9 = arith.constant 0 : index
    %13 = vector.load %arg4[%c0_7, %c0_8, %c0_9] : memref<3x128x128xf32, #tpu.memory_space<vmem>>, vector<1x128x128xf32>
    %14 = vector.shape_cast %13 : vector<1x128x128xf32> to vector<128x128xf32>
    %cst_10 = arith.constant dense<0.000000e+00> : vector<16x128xf32>
    %15 = tpu.matmul %12, %14, %cst_10 {dimension_numbers = #tpu.dot_dimension_numbers<[1], [0], [0], [1], [0, 0, 1, 1], [], []>} : vector<16x128xf32>, vector<128x128xf32>, vector<16x128xf32> -> vector<16x128xf32>
    %16 = vector.extract_strided_slice %11 {offsets = [1, 0], sizes = [16, 128], strides = [1, 1]} : vector<18x128xf32> to vector<16x128xf32>
    %c1 = arith.constant 1 : index
    %c0_11 = arith.constant 0 : index
    %c0_12 = arith.constant 0 : index
    %17 = vector.load %arg4[%c1, %c0_11, %c0_12] : memref<3x128x128xf32, #tpu.memory_space<vmem>>, vector<1x128x128xf32>
    %18 = vector.shape_cast %17 : vector<1x128x128xf32> to vector<128x128xf32>
    %cst_13 = arith.constant dense<0.000000e+00> : vector<16x128xf32>
    %19 = tpu.matmul %16, %18, %cst_13 {dimension_numbers = #tpu.dot_dimension_numbers<[1], [0], [0], [1], [0, 0, 1, 1], [], []>} : vector<16x128xf32>, vector<128x128xf32>, vector<16x128xf32> -> vector<16x128xf32>
    %20 = arith.addf %15, %19 : vector<16x128xf32>
    %21 = vector.extract_strided_slice %11 {offsets = [2, 0], sizes = [16, 128], strides = [1, 1]} : vector<18x128xf32> to vector<16x128xf32>
    %c2 = arith.constant 2 : index
    %c0_14 = arith.constant 0 : index
    %c0_15 = arith.constant 0 : index
    %22 = vector.load %arg4[%c2, %c0_14, %c0_15] : memref<3x128x128xf32, #tpu.memory_space<vmem>>, vector<1x128x128xf32>
    %23 = vector.shape_cast %22 : vector<1x128x128xf32> to vector<128x128xf32>
    %cst_16 = arith.constant dense<0.000000e+00> : vector<16x128xf32>
    %24 = tpu.matmul %21, %23, %cst_16 {dimension_numbers = #tpu.dot_dimension_numbers<[1], [0], [0], [1], [0, 0, 1, 1], [], []>} : vector<16x128xf32>, vector<128x128xf32>, vector<16x128xf32> -> vector<16x128xf32>
    %25 = arith.addf %20, %24 : vector<16x128xf32>
    %c0_17 = arith.constant 0 : index
    %c0_18 = arith.constant 0 : index
    %26 = vector.load %arg5[%c0_17, %c0_18] : memref<1x128xf32, #tpu.memory_space<vmem>>, vector<1x128xf32>
    %27 = vector.broadcast %26 : vector<1x128xf32> to vector<16x128xf32>
    %28 = arith.addf %25, %27 : vector<16x128xf32>
    %c0_19 = arith.constant 0 : index
    %c0_20 = arith.constant 0 : index
    %c0_21 = arith.constant 0 : index
    %29 = vector.load %arg6[%c0_19, %c0_20, %c0_21] : memref<1x16x128xf32, #tpu.memory_space<vmem>>, vector<1x16x128xf32>
    %30 = vector.shape_cast %29 : vector<1x16x128xf32> to vector<16x128xf32>
    %31 = vector.shape_cast %28 : vector<16x128xf32> to vector<1x16x128xf32>
    tpu.vector_store %arg6[%c0_19, %c0_20, %c0_21], %31 {strides = array<i32>} : memref<1x16x128xf32, #tpu.memory_space<vmem>>, vector<1x16x128xf32>,
    %cst_22 = arith.constant dense<0.000000e+00> : vector<128xf32>
    %32 = vector.multi_reduction <add>, %28, %cst_22 [0] : vector<16x128xf32> to vector<128xf32>
    %33 = vector.shape_cast %32 : vector<128xf32> to vector<1x128xf32>
    %34 = arith.mulf %28, %28 : vector<16x128xf32>
    %cst_23 = arith.constant dense<0.000000e+00> : vector<128xf32>
    %35 = vector.multi_reduction <add>, %34, %cst_23 [0] : vector<16x128xf32> to vector<128xf32>
    %36 = vector.shape_cast %35 : vector<128xf32> to vector<1x128xf32>
    %37 = tpu.concatenate %33, %36 in 0 : vector<1x128xf32>, vector<1x128xf32> -> vector<2x128xf32>
    %c0_24 = arith.constant 0 : index
    %c0_25 = arith.constant 0 : index
    %c0_26 = arith.constant 0 : index
    %38 = vector.load %arg7[%c0_24, %c0_25, %c0_26] : memref<1x2x128xf32, #tpu.memory_space<vmem>>, vector<1x2x128xf32>
    %39 = vector.shape_cast %38 : vector<1x2x128xf32> to vector<2x128xf32>
    %40 = vector.shape_cast %37 : vector<2x128xf32> to vector<1x2x128xf32>
    tpu.vector_store %arg7[%c0_24, %c0_25, %c0_26], %40 {strides = array<i32>} : memref<1x2x128xf32, #tpu.memory_space<vmem>>, vector<1x2x128xf32>,
    return
  }
  func.func @transform_0(%arg0: i32) -> (i32, i32, i32) {
    %c0_i32 = arith.constant 0 : i32
    %c0_i32_0 = arith.constant 0 : i32
    %c0_i32_1 = arith.constant 0 : i32
    return %arg0, %c0_i32, %c0_i32_0 : i32, i32, i32
  }
  func.func @transform_1(%arg0: i32) -> (i32, i32) {
    %c0_i32 = arith.constant 0 : i32
    %c0_i32_0 = arith.constant 0 : i32
    %c0_i32_1 = arith.constant 0 : i32
    return %c0_i32, %c0_i32_0 : i32, i32
  }
  func.func @transform_2(%arg0: i32) -> (i32, i32) {
    %c0_i32 = arith.constant 0 : i32
    %c0_i32_0 = arith.constant 0 : i32
    %c0_i32_1 = arith.constant 0 : i32
    return %c0_i32, %c0_i32_0 : i32, i32
  }
  func.func @transform_3(%arg0: i32) -> (i32, i32, i32) {
    %c0_i32 = arith.constant 0 : i32
    %c0_i32_0 = arith.constant 0 : i32
    %c0_i32_1 = arith.constant 0 : i32
    %c0_i32_2 = arith.constant 0 : i32
    return %c0_i32, %c0_i32_0, %c0_i32_1 : i32, i32, i32
  }
  func.func @transform_4(%arg0: i32) -> (i32, i32) {
    %c0_i32 = arith.constant 0 : i32
    %c0_i32_0 = arith.constant 0 : i32
    %c0_i32_1 = arith.constant 0 : i32
    return %c0_i32, %c0_i32_0 : i32, i32
  }
  func.func @transform_5(%arg0: i32) -> (i32, i32, i32) {
    %c0_i32 = arith.constant 0 : i32
    %c0_i32_0 = arith.constant 0 : i32
    %c0_i32_1 = arith.constant 0 : i32
    return %arg0, %c0_i32, %c0_i32_0 : i32, i32, i32
  }
  func.func @transform_6(%arg0: i32) -> (i32, i32, i32) {
    %c0_i32 = arith.constant 0 : i32
    %c0_i32_0 = arith.constant 0 : i32
    %c0_i32_1 = arith.constant 0 : i32
    return %arg0, %c0_i32, %c0_i32_0 : i32, i32, i32
  }
}

module attributes {stable_mosaic.version = 11 : i64} {
  func.func @_affine_relu_kernel(%arg0: i32, %arg1: memref<1x16x128xf32, #tpu.memory_space<vmem>>, %arg2: memref<1x128xf32, #tpu.memory_space<vmem>>, %arg3: memref<1x128xf32, #tpu.memory_space<vmem>>, %arg4: memref<1x16x128xf32, #tpu.memory_space<vmem>>) attributes {dimension_semantics = [#tpu.dimension_semantics<parallel>], iteration_bounds = array<i64: 2>, scalar_prefetch = 0 : i64, scratch_operands = 0 : i64, tpu.core_type = #tpu.core_type<tc>, window_params = [{transform_indices = @transform_0, window_bounds = array<i64: 1, 16, 128>}, {pipeline_mode = #tpu.pipeline_mode<synchronous>, transform_indices = @transform_1, window_bounds = array<i64: 1, 128>}, {pipeline_mode = #tpu.pipeline_mode<synchronous>, transform_indices = @transform_2, window_bounds = array<i64: 1, 128>}, {transform_indices = @transform_3, window_bounds = array<i64: 1, 16, 128>}]} {
    %c0 = arith.constant 0 : index
    %c0_0 = arith.constant 0 : index
    %c0_1 = arith.constant 0 : index
    %0 = vector.load %arg1[%c0, %c0_0, %c0_1] : memref<1x16x128xf32, #tpu.memory_space<vmem>>, vector<1x16x128xf32>
    %1 = vector.shape_cast %0 : vector<1x16x128xf32> to vector<16x128xf32>
    %c0_2 = arith.constant 0 : index
    %c0_3 = arith.constant 0 : index
    %2 = vector.load %arg2[%c0_2, %c0_3] : memref<1x128xf32, #tpu.memory_space<vmem>>, vector<1x128xf32>
    %3 = vector.broadcast %2 : vector<1x128xf32> to vector<16x128xf32>
    %4 = arith.mulf %1, %3 : vector<16x128xf32>
    %c0_4 = arith.constant 0 : index
    %c0_5 = arith.constant 0 : index
    %5 = vector.load %arg3[%c0_4, %c0_5] : memref<1x128xf32, #tpu.memory_space<vmem>>, vector<1x128xf32>
    %6 = vector.broadcast %5 : vector<1x128xf32> to vector<16x128xf32>
    %7 = arith.addf %4, %6 : vector<16x128xf32>
    %cst = arith.constant 0.000000e+00 : f32
    %8 = vector.broadcast %cst : f32 to vector<16x128xf32>
    %9 = arith.maximumf %7, %8 : vector<16x128xf32>
    %c0_6 = arith.constant 0 : index
    %c0_7 = arith.constant 0 : index
    %c0_8 = arith.constant 0 : index
    %10 = vector.load %arg4[%c0_6, %c0_7, %c0_8] : memref<1x16x128xf32, #tpu.memory_space<vmem>>, vector<1x16x128xf32>
    %11 = vector.shape_cast %10 : vector<1x16x128xf32> to vector<16x128xf32>
    %12 = vector.shape_cast %9 : vector<16x128xf32> to vector<1x16x128xf32>
    tpu.vector_store %arg4[%c0_6, %c0_7, %c0_8], %12 {strides = array<i32>} : memref<1x16x128xf32, #tpu.memory_space<vmem>>, vector<1x16x128xf32>,
    return
  }
  func.func @transform_0(%arg0: i32) -> (i32, i32, i32) {
    %c0_i32 = arith.constant 0 : i32
    %c0_i32_0 = arith.constant 0 : i32
    %c0_i32_1 = arith.constant 0 : i32
    return %arg0, %c0_i32, %c0_i32_0 : i32, i32, i32
  }
  func.func @transform_1(%arg0: i32) -> (i32, i32) {
    %c0_i32 = arith.constant 0 : i32
    %c0_i32_0 = arith.constant 0 : i32
    %c0_i32_1 = arith.constant 0 : i32
    return %c0_i32, %c0_i32_0 : i32, i32
  }
  func.func @transform_2(%arg0: i32) -> (i32, i32) {
    %c0_i32 = arith.constant 0 : i32
    %c0_i32_0 = arith.constant 0 : i32
    %c0_i32_1 = arith.constant 0 : i32
    return %c0_i32, %c0_i32_0 : i32, i32
  }
  func.func @transform_3(%arg0: i32) -> (i32, i32, i32) {
    %c0_i32 = arith.constant 0 : i32
    %c0_i32_0 = arith.constant 0 : i32
    %c0_i32_1 = arith.constant 0 : i32
    return %arg0, %c0_i32, %c0_i32_0 : i32, i32, i32
  }
}

</mosaic_0001>

<bundles_post_ra>
// kernel: tile.33
= control target key start
LH: loop header
LB: loop body
LE: loop exit
PB: predicated region body
PF: predicated region fallthrough
CT: control target
= control target key end

     0   :  { %s28_s0 = inlined_call_operand.vmem [shape: f32[8], index: 0, kind: input, shape index: {}]   ;;  %s29_s1 = inlined_call_operand.vmem [shape: f32[16,8], index: 1, kind: output, shape index: {}]  }
   0x1   :  { %v4_v0 = vld [vmem:[%s28_s0] ss:$0 sm:$0xff] }
   0x2   :  { %5 = vst [vmem:[%s29_s1] sm:$0xff] %v4_v0  ;;  %8 = vst [vmem:[%s29_s1 + $0x8] sm:$0xff] %v4_v0 }

// kernel: tile.34
= control target key start
LH: loop header
LB: loop body
LE: loop exit
PB: predicated region body
PF: predicated region fallthrough
CT: control target
= control target key end

     0   :  { %s131_s10 = smov 120   ;;  %s132_s11 = smov 104   ;;  %vm3_vm0 = vcmask 64512   ;;  %vm9_vm1 = vcmask 1048512   ;;  %vm15_vm2 = vcmask 982912   ;;  %vm21_vm3 = vcmask 917312   ;;  %s207_s0 = inlined_call_operand.vmem [shape: f32[16,8], index: 0, kind: input, shape index: {}]   ;;  %s208_s1 = inlined_call_operand.vmem [shape: f32[1,128], index: 1, kind: output, shape index: {}]  }
   0x1   :  { %v101_v0 = vld [vmem:[%s207_s0 + $0xf] sm:$0x1]   ;;  %v103_v1 = vld [vmem:[%s207_s0 + $0xd] sm:$0x1]   ;;  %v102_v2 = vld [vmem:[%s207_s0 + $0xe] sm:$0x1]  }
   0x2   :  { %7 = vrot.lane.b32.xlu0 %v101_v0, %s131_s10  ;;  %19 = vrot.lane.b32.xlu1 %v103_v1, %s132_s11  ;;  %v104_v3 = vld [vmem:[%s207_s0 + $0xc] sm:$0x1]   ;;  %s133_s16 = smov 112   ;;  %s134_s17 = smov 96   ;;  %v105_v4 = vld [vmem:[%s207_s0 + $0xb] sm:$0x1]  }
   0x3   :  { %v106_v5 = vld [vmem:[%s207_s0 + $0xa] sm:$0x1]   ;;  %v2_v6 = vld [vmem:[%s207_s0] sm:$0x1]   ;;  %s135_s24 = smov 88   ;;  %s136_s25 = smov 80  }
   0x4   :  { %4 = vst.msk [vmem:[#allocation0] sm:$0x1] %vm3_vm0, %v2_v6   ;;  %v107_v7 = vld [vmem:[%s207_s0 + $0x9] sm:$0x1]   ;;  %v108_v8 = vld [vmem:[%s207_s0 + $0x8] sm:$0x1]  }
   0x5   :  { %s137_s30 = smov 72   ;;  %s138_s2 = smov 64   ;;  %v109_v9 = vld [vmem:[%s207_s0 + $0x7] sm:$0x1]   ;;  %v110_v10 = vld [vmem:[%s207_s0 + $0x6] sm:$0x1]  }
   0x6   :  { %13 = vrot.lane.b32.xlu0 %v102_v2, %s133_s16  ;;  %25 = vrot.lane.b32.xlu1 %v104_v3, %s134_s17  ;;  %s139_s7 = smov 56   ;;  %s140_s8 = smov 48   ;;  %v111_v11 = vld [vmem:[%s207_s0 + $0x5] sm:$0x1]   ;;  %v112_v12 = vld [vmem:[%s207_s0 + $0x4] sm:$0x1]  }
   0x7   :  { %s141_s13 = smov 40   ;;  %s142_s14 = smov 32   ;;  %v113_v13 = vld [vmem:[%s207_s0 + $0x3] sm:$0x1]   ;;  %v114_v14 = vld [vmem:[%s207_s0 + $0x2] sm:$0x1]  }
   0x8   :  { %s143_s19 = smov 24   ;;  %s144_s20 = smov 16   ;;  %v115_v15 = vld [vmem:[%s207_s0 + $0x1] sm:$0x1]   ;;  %vm27_vm4 = vcmask 851712   ;;  %vm33_vm5 = vcmask 786112  }
   0x9   :  { %s145_s0 = smov 8   ;;  %vm39_vm6 = vcmask 720512   ;;  %vm45_vm7 = vcmask 654912   ;;  %vm51_vm8 = vcmask 589312   ;;  %vm57_vm9 = vcmask 523712  }
   0xa   :  { %31 = vrot.lane.b32.xlu0 %v105_v4, %s135_s24  ;;  %37 = vrot.lane.b32.xlu1 %v106_v5, %s136_s25  ;;  %vm63_vm10 = vcmask 458112   ;;  %vm69_vm11 = vcmask 392512   ;;  %vm75_vm12 = vcmask 326912   ;;  %vm81_vm13 = vcmask 261312  }
   0xb   :  { %vm87_vm14 = vcmask 195712   ;;  %vm93_vm15 = vcmask 130112  }
   0xe   :  { %43 = vrot.lane.b32.xlu0 %v107_v7, %s137_s30  ;;  %49 = vrot.lane.b32.xlu1 %v108_v8, %s138_s2 }
  0x12   :  { %55 = vrot.lane.b32.xlu0 %v109_v9, %s139_s7  ;;  %61 = vrot.lane.b32.xlu1 %v110_v10, %s140_s8 }
  0x16   :  { %67 = vrot.lane.b32.xlu0 %v111_v11, %s141_s13  ;;  %73 = vrot.lane.b32.xlu1 %v112_v12, %s142_s14 }
  0x1a   :  { %79 = vrot.lane.b32.xlu0 %v113_v13, %s143_s19  ;;  %85 = vrot.lane.b32.xlu1 %v114_v14, %s144_s20 }
  0x1e   :  { %91 = vrot.lane.b32.xlu0 %v115_v15, %s145_s0 }
  0x74   :  { %v8_v16 = vpop.permute.xlu0 %7   ;;  %v20_v17 = vpop.permute.xlu1 %19  }
  0x75   :  { %10 = vst.msk [vmem:[#allocation0] sm:$0x1] %vm9_vm1, %v8_v16  }
  0x78   :  { %v14_v18 = vpop.permute.xlu0 %13   ;;  %v26_v19 = vpop.permute.xlu1 %25  }
  0x79   :  { %16 = vst.msk [vmem:[#allocation0] sm:$0x1] %vm15_vm2, %v14_v18  }
  0x7a   :  { %22 = vst.msk [vmem:[#allocation0] sm:$0x1] %vm21_vm3, %v20_v17  }
  0x7b   :  { %28 = vst.msk [vmem:[#allocation0] sm:$0x1] %vm27_vm4, %v26_v19  }
  0x7c   :  { %v32_v20 = vpop.permute.xlu0 %31   ;;  %v38_v21 = vpop.permute.xlu1 %37  }
  0x7d   :  { %34 = vst.msk [vmem:[#allocation0] sm:$0x1] %vm33_vm5, %v32_v20  }
  0x7e   :  { %40 = vst.msk [vmem:[#allocation0] sm:$0x1] %vm39_vm6, %v38_v21  }
  0x80   :  { %v44_v22 = vpop.permute.xlu0 %43   ;;  %v50_v23 = vpop.permute.xlu1 %49  }
  0x81   :  { %46 = vst.msk [vmem:[#allocation0] sm:$0x1] %vm45_vm7, %v44_v22  }
  0x82   :  { %52 = vst.msk [vmem:[#allocation0] sm:$0x1] %vm51_vm8, %v50_v23  }
  0x84   :  { %v56_v24 = vpop.permute.xlu0 %55   ;;  %v62_v25 = vpop.permute.xlu1 %61  }
  0x85   :  { %58 = vst.msk [vmem:[#allocation0] sm:$0x1] %vm57_vm9, %v56_v24  }
  0x86   :  { %64 = vst.msk [vmem:[#allocation0] sm:$0x1] %vm63_vm10, %v62_v25  }
  0x88   :  { %v68_v26 = vpop.permute.xlu0 %67   ;;  %v74_v27 = vpop.permute.xlu1 %73  }
  0x89   :  { %70 = vst.msk [vmem:[#allocation0] sm:$0x1] %vm69_vm11, %v68_v26  }
  0x8a   :  { %76 = vst.msk [vmem:[#allocation0] sm:$0x1] %vm75_vm12, %v74_v27  }
  0x8c   :  { %v80_v28 = vpop.permute.xlu0 %79   ;;  %v86_v29 = vpop.permute.xlu1 %85  }
  0x8d   :  { %82 = vst.msk [vmem:[#allocation0] sm:$0x1] %vm81_vm13, %v80_v28  }
  0x8e   :  { %88 = vst.msk [vmem:[#allocation0] sm:$0x1] %vm87_vm14, %v86_v29  }
  0x90   :  { %v92_v30 = vpop.permute.xlu0 %91  }
  0x91   :  { %94 = vst.msk [vmem:[#allocation0] sm:$0x1] %vm93_vm15, %v92_v30  }
  0x98   :  { %v98_v31 = vld [vmem:[#allocation0] sm:$0x1] }
  0x99   :  { %100 = vst [vmem:[%s208_s1] sm:$0x1] %v98_v31 }

// kernel: upconv_forward.3
= control target key start
LH: loop header
LB: loop body
LE: loop exit
PB: predicated region body
PF: predicated region fallthrough
CT: control target
= control target key end

     0   :  { %s1644_s27 = smov 0   ;;  %s1884_s0 = inlined_call_operand.vmem [shape: f32[2,16,64], index: 0, kind: input, shape index: {}]   ;;  %s1885_s1 = inlined_call_operand.vmem [shape: f32[2,8,32], index: 1, kind: input, shape index: {}]   ;;  %s1886_s2 = inlined_call_operand.vmem [shape: f32[32,64], index: 2, kind: input, shape index: {}]   ;;  %s1887_s3 = inlined_call_operand.vmem [shape: f32[16,8], index: 3, kind: input, shape index: {}]   ;;  %s1888_s4 = inlined_call_operand.vmem [shape: f32[3,64,128], index: 4, kind: input, shape index: {}]   ;;  %s1889_s5 = inlined_call_operand.vmem [shape: f32[3,64,128], index: 5, kind: input, shape index: {}]   ;;  %s1890_s6 = inlined_call_operand.vmem [shape: f32[1,128], index: 6, kind: input, shape index: {}]   ;;  %s1891_s7 = inlined_call_operand.vmem [shape: f32[2,16,128], index: 7, kind: output, shape index: {0}]   ;;  %s1892_s8 = inlined_call_operand.vmem [shape: f32[2,2,128], index: 8, kind: output, shape index: {1}]  }
   0x1 LB: > { %s1204_s28 = sadd.s32 4294967295, %s1594_s27   ;;  %p1208_p0 = scmp.ge.s32.totalorder %s1594_s27, 1  ;;  %s1594_s27 = sphi %s1644_s27, %s19_s27  }
   0x2   : > { %p274_p1 = scmp.lt.s32.totalorder %s1594_s27, 3 }
   0x4   : > { %p275_p2 = pnand %p1208_p0, %p274_p1 }
   0x5   : > { %v335_v0 = vld [vmem:[%s1886_s2] sm:$0xff] (!%p275_p2)  ;;  %v336_v1 = vld [vmem:[%s1886_s2 + $0x8] sm:$0xff] (!%p275_p2)  ;;  %v337_v2 = vld [vmem:[%s1886_s2 + $0x10] sm:$0xff] (!%p275_p2)  ;;  %v1596_v3 = vmov (!%p275_p2), 0.0|0.0   ;;  %vm1597_vm0 = vmmov (!%p275_p2), 0   ;;  %v1598_v6 = vmov (!%p275_p2), 0.0  }
   0x6   : > { %278 = sbr.rel (%p275_p2) target bundleno = 718 (0x2ce), region = 48  ;;  %1465 = vmatprep.subr.bf16.mxu0 (!%p275_p2), %v1596_v3  ;;  %v1466_v4 = vpack.c.bf16 (!%p275_p2), %v336_v1, %v335_v0  ;;  %v338_v5 = vld [vmem:[%s1886_s2 + $0x18] sm:$0xff] (!%p275_p2)  ;;  %1343 = vmatprep.mubr.msk.f32.mxu0 (!%p275_p2), %vm1597_vm0, %v1598_v6  ;;  %p316_p3 = scmp.lt.s32.totalorder (!%p275_p2), %s1204_s28, 1  ;;  %vm339_vm1 = vcmask (!%p275_p2), 261120   ;;  %v413_v9 = vld [vmem:[%s1887_s3] sm:$0xff] (!%p275_p2)  ;;  %vm415_vm2 = vcmask (!%p275_p2), 64512  }
   0x7   : > { %v1469_v7 = vpack.c.bf16 (!%p275_p2), %v338_v5, %v337_v2  ;;  %1348 = vmatprep.mubr.msk.f32.mxu1 (!%p275_p2), %vm415_vm2, %v413_v9  ;;  %v1218_v10 = vld [vmem:[%s1888_s4 + $0x40] sm:$0xff] (!%p275_p2)  ;;  %v1219_v11 = vld [vmem:[%s1888_s4 + $0x48] sm:$0xff] (!%p275_p2)  ;;  %v1220_v12 = vld [vmem:[%s1888_s4 + $0x50] sm:$0xff] (!%p275_p2)  ;;  %vm501_vm3 = vcmask (!%p275_p2), 1040384   ;;  %vm528_vm4 = vcmask (!%p275_p2), 1046528   ;;  %vm534_vm5 = vcmask (!%p275_p2), 523264  }
   0x8   : > { %1467 = vmatpush3.bf16.msra.mxu0 (!%p275_p2), %v1466_v4  ;;  %v1471_v13 = vpack.c.bf16 (!%p275_p2), %v1219_v11, %v1218_v10  ;;  %v1221_v14 = vld [vmem:[%s1888_s4 + $0x58] sm:$0xff] (!%p275_p2)  ;;  %v1222_v16 = vld [vmem:[%s1888_s4 + $0x60] sm:$0xff] (!%p275_p2)  ;;  %v1223_v17 = vld [vmem:[%s1888_s4 + $0x68] sm:$0xff] (!%p275_p2)  ;;  %vm702_vm6 = vcmask (!%p275_p2), 1045504  }
   0x9   : > { %1468 = vmatprep.subr.bf16.mxu0 (!%p275_p2), %v1596_v3  ;;  %v1475_v15 = vpack.c.bf16 (!%p275_p2), %v1221_v14, %v1220_v12  ;;  %v1479_v22 = vpack.c.bf16 (!%p275_p2), %v1223_v17, %v1222_v16  ;;  %v1224_v24 = vld [vmem:[%s1888_s4 + $0x70] sm:$0xff] (!%p275_p2)  ;;  %v1225_v25 = vld [vmem:[%s1888_s4 + $0x78] sm:$0xff] (!%p275_p2)  ;;  %v509_v32 = vld [vmem:[%s1888_s4] sm:$0xff] (!%p275_p2) }
   0xa   : > { %v1483_v29 = vpack.c.bf16 (!%p275_p2), %v1225_v25, %v1224_v24  ;;  %v510_v33 = vld [vmem:[%s1888_s4 + $0x8] sm:$0xff] (!%p275_p2)  ;;  %v511_v36 = vld [vmem:[%s1888_s4 + $0x10] sm:$0xff] (!%p275_p2)  ;;  %v512_v37 = vld [vmem:[%s1888_s4 + $0x18] sm:$0xff] (!%p275_p2) }
   0xb   : > { %v1487_v35 = vpack.c.bf16 (!%p275_p2), %v510_v33, %v509_v32  ;;  %v1491_v39 = vpack.c.bf16 (!%p275_p2), %v512_v37, %v511_v36  ;;  %v513_v40 = vld [vmem:[%s1888_s4 + $0x20] sm:$0xff] (!%p275_p2)  ;;  %v514_v41 = vld [vmem:[%s1888_s4 + $0x28] sm:$0xff] (!%p275_p2)  ;;  %v515_v43 = vld [vmem:[%s1888_s4 + $0x30] sm:$0xff] (!%p275_p2) }
   0xc   : > { %1470 = vmatpush3.bf16.msra.mxu0 (!%p275_p2), %v1469_v7  ;;  %v1495_v42 = vpack.c.bf16 (!%p275_p2), %v514_v41, %v513_v40  ;;  %v516_v44 = vld [vmem:[%s1888_s4 + $0x38] sm:$0xff] (!%p275_p2)  ;;  %v1230_v46 = vld [vmem:[%s1888_s4 + $0x80] sm:$0xff] (!%p275_p2)  ;;  %v1231_v47 = vld [vmem:[%s1888_s4 + $0x88] sm:$0xff] (!%p275_p2) }
   0xd   : > { %s1894_s28 = smov (!%p316_p3, %s1204_s28), 1  ;;  %1472 = vmatprep.subr.bf16.mxu0 %v1471_v13  ;;  %v1499_v45 = vpack.c.bf16 %v516_v44, %v515_v43  ;;  %v1503_v48 = vpack.c.bf16 %v1231_v47, %v1230_v46  ;;  %v1232_v49 = vld [vmem:[%s1888_s4 + $0x90] sm:$0xff]  ;;  %v1233_v50 = vld [vmem:[%s1888_s4 + $0x98] sm:$0xff]  ;;  %v1240_v52 = vld [vmem:[%s1889_s5 + $0x40] sm:$0xff] }
   0xe   : > { %s1211_s15 = sshll.u32 %s1894_s28, 3  ;;  %s1265_s19 = sshll.u32 %s1894_s28, 4  ;;  %v1507_v51 = vpack.c.bf16 %v1233_v50, %v1232_v49  ;;  %v1241_v53 = vld [vmem:[%s1889_s5 + $0x48] sm:$0xff]  ;;  %v1242_v54 = vld [vmem:[%s1889_s5 + $0x50] sm:$0xff]  ;;  %v1243_v55 = vld [vmem:[%s1889_s5 + $0x58] sm:$0xff] }
   0xf   : > { %s324_s18 = scalar_lea.vmem %s1885_s1, %s1211_s15  ;;  %s320_s10 = scalar_lea.vmem %s1884_s0, %s1265_s19  ;;  %v1519_v56 = vpack.c.bf16 %v1241_v53, %v1240_v52  ;;  %v414_v58 = vld [vmem:[%s1887_s3 + $0x8] sm:$0xff]  ;;  %v1523_v60 = vpack.c.bf16 %v1243_v55, %v1242_v54  ;;  %v1234_v61 = vld [vmem:[%s1888_s4 + $0xa0] sm:$0xff]  ;;  %v1236_v3 = vld [vmem:[%s1888_s4 + $0xb0] sm:$0xff] }
  0x10   : > { %v334_v8 = vld [vmem:[%s324_s18] sm:$0xff]  ;;  %v498_v19 = vld [vmem:[%s320_s10 + $0x8] sm:$0xff]  ;;  %v1237_v4 = vld [vmem:[%s1888_s4 + $0xb8] sm:$0xff]  ;;  %s329_s12 = scalar_lea.vmem %s1891_s7, %s1265_s19  ;;  %s1214_s19 = sshll.u32 %s1894_s28, 1 }
  0x11   : > { %1344 = vmatmul.mubr.msk.f32.vlgmr.msra.gmra.mrb[0].mxu0 %vm339_vm1, %v334_v8  ;;  %v497_v18 = vld [vmem:[%s320_s10] sm:$0xff]  ;;  %v503_v21 = vrot.slane %v498_v19, 7  ;;  %v1235_v62 = vld [vmem:[%s1888_s4 + $0xa8] sm:$0xff]  ;;  %v1246_v5 = vld [vmem:[%s1889_s5 + $0x70] sm:$0xff]  ;;  %v1515_v6 = vpack.c.bf16 %v1237_v4, %v1236_v3  ;;  %s333_s15 = scalar_lea.vmem %s1892_s8, %s1214_s19 }
  0x12   : > { %v502_v20 = vrot.slane %v497_v18, 7  ;;  %1474 = vmatpush3.bf16.msra.mxu0 %v1471_v13  ;;  %v1244_v63 = vld [vmem:[%s1889_s5 + $0x60] sm:$0xff]  ;;  %v1511_v0 = vpack.c.bf16 %v1235_v62, %v1234_v61  ;;  %v1245_v1 = vld [vmem:[%s1889_s5 + $0x68] sm:$0xff]  ;;  %v1247_v7 = vld [vmem:[%s1889_s5 + $0x78] sm:$0xff] }
  0x13   : > { %1476 = vmatprep.subr.bf16.mxu0 %v1475_v15  ;;  %v1714_v31 = vsel %vm501_vm3, %v503_v21, 0.0  ;;  %v1527_v2 = vpack.c.bf16 %v1245_v1, %v1244_v63  ;;  %v1531_v8 = vpack.c.bf16 %v1247_v7, %v1246_v5  ;;  %v798_v12 = vld [vmem:[%s1889_s5] sm:$0xff]  ;;  %v799_v13 = vld [vmem:[%s1889_s5 + $0x8] sm:$0xff]  ;;  %v804_v40 = vld [vmem:[%s1889_s5 + $0x30] sm:$0xff] }
  0x14   : > { %v1699_v23 = vsel %vm501_vm3, 0.0, %v502_v20  ;;  %v1708_v26 = vsel %vm501_vm3, %v502_v20, %v503_v21  ;;  %v532_v34 = vrot.slane %v1714_v31, 1  ;;  %v706_v11 = vrot.slane %v1714_v31, 2  ;;  %v802_v37 = vld [vmem:[%s1889_s5 + $0x20] sm:$0xff]  ;;  %v805_v41 = vld [vmem:[%s1889_s5 + $0x38] sm:$0xff]  ;;  %v1253_v44 = vld [vmem:[%s1889_s5 + $0x88] sm:$0xff] }
  0x15   : > { %v529_v27 = vrot.slane %v1699_v23, 1  ;;  %v530_v28 = vrot.slane %v1708_v26, 1  ;;  %v703_v9 = vrot.slane %v1699_v23, 2  ;;  %v704_v10 = vrot.slane %v1708_v26, 2  ;;  %v1252_v43 = vld [vmem:[%s1889_s5 + $0x80] sm:$0xff]  ;;  %v1254_v46 = vld [vmem:[%s1889_s5 + $0x90] sm:$0xff] }
  0x16   : > { %1478 = vmatpush3.bf16.msra.mxu0 %v1475_v15  ;;  %v1535_v15 = vpack.c.bf16 %v799_v13, %v798_v12  ;;  %v1255_v47 = vld [vmem:[%s1889_s5 + $0x98] sm:$0xff]  ;;  %v1256_v49 = vld [vmem:[%s1889_s5 + $0xa0] sm:$0xff]  ;;  %v1257_v50 = vld [vmem:[%s1889_s5 + $0xa8] sm:$0xff] }
  0x17   : > { %1480 = vmatprep.subr.bf16.mxu0 %v1479_v22  ;;  %v531_v30 = vsel %vm528_vm4, %v529_v27, %v530_v28  ;;  %v533_v38 = vsel %vm528_vm4, %v530_v28, %v532_v34  ;;  %v705_v14 = vsel %vm702_vm6, %v703_v9, %v704_v10  ;;  %v707_v16 = vsel %vm702_vm6, %v704_v10, %v706_v11  ;;  %v1258_v52 = vld [vmem:[%s1889_s5 + $0xb0] sm:$0xff]  ;;  %v1259_v53 = vld [vmem:[%s1889_s5 + $0xb8] sm:$0xff] }
  0x18   : > { %1367 = vmatprep.mubr.msk.f32.mxu0 %vm534_vm5, %v531_v30  ;;  %v1563_v54 = vpack.c.bf16 %v1259_v53, %v1258_v52 }
  0x1a   : > { %1482 = vmatpush3.bf16.msra.mxu0 %v1479_v22  ;;  %v800_v22 = vld [vmem:[%s1889_s5 + $0x10] sm:$0xff] }
  0x1b   : > { %1484 = vmatprep.subr.bf16.mxu0 %v1483_v29 }
  0x1e   : > { %1486 = vmatpush3.bf16.msra.mxu0 %v1483_v29 }
  0x1f   : > { %1488 = vmatprep.subr.bf16.mxu0 %v1487_v35 }
  0x21   : > { %1368 = vmatmul.mubr.msk.f32.vlgmr.msra.gmra.mrb[2].mxu0 %vm534_vm5, %v533_v38  ;;  %v803_v38 = vld [vmem:[%s1889_s5 + $0x28] sm:$0xff] }
  0x22   : > { %1490 = vmatpush3.bf16.msra.mxu0 %v1487_v35  ;;  %1386 = vmatprep.mubr.msk.f32.mxu0 %vm534_vm5, %v1699_v23  ;;  %v801_v23 = vld [vmem:[%s1889_s5 + $0x18] sm:$0xff] }
  0x23   : > { %1492 = vmatprep.subr.bf16.mxu0 %v1491_v39  ;;  %v1539_v32 = vpack.c.bf16 %v801_v23, %v800_v22 }
  0x26   : > { %1494 = vmatpush3.bf16.msra.mxu0 %v1491_v39  ;;  %v1543_v39 = vpack.c.bf16 %v803_v38, %v802_v37 }
  0x27   : > { %1496 = vmatprep.subr.bf16.mxu0 %v1495_v42 }
  0x2a   : > { %1498 = vmatpush3.bf16.msra.mxu0 %v1495_v42  ;;  %v1547_v42 = vpack.c.bf16 %v805_v41, %v804_v40 }
  0x2b   : > { %1500 = vmatprep.subr.bf16.mxu0 %v1499_v45 }
  0x2e   : > { %1502 = vmatpush3.bf16.msra.mxu0 %v1499_v45  ;;  %v1551_v45 = vpack.c.bf16 %v1253_v44, %v1252_v43 }
  0x2f   : > { %1504 = vmatprep.subr.bf16.mxu0 %v1503_v48 }
  0x31   : > { %1387 = vmatmul.mubr.msk.f32.vlgmr.msra.gmra.mrb[2].mxu0 %vm534_vm5, %v1708_v26 }
  0x32   : > { %1506 = vmatpush3.bf16.msra.mxu0 %v1503_v48  ;;  %1405 = vmatprep.mubr.msk.f32.mxu0 %vm534_vm5, %v705_v14  ;;  %v1555_v48 = vpack.c.bf16 %v1255_v47, %v1254_v46 }
  0x33   : > { %1508 = vmatprep.subr.bf16.mxu0 %v1507_v51 }
  0x36   : > { %1510 = vmatpush3.bf16.msra.mxu0 %v1507_v51  ;;  %v1559_v51 = vpack.c.bf16 %v1257_v50, %v1256_v49 }
  0x37   : > { %1512 = vmatprep.subr.bf16.mxu0 %v1511_v0 }
  0x3a   : > { %1514 = vmatpush3.bf16.msra.mxu0 %v1511_v0 }
  0x3b   : > { %1516 = vmatprep.subr.bf16.mxu0 %v1515_v6 }
  0x3e   : > { %1518 = vmatpush3.bf16.msra.mxu0 %v1515_v6 }
  0x41   : > { %1406 = vmatmul.mubr.msk.f32.vlgmr.msra.gmra.mrb[2].mxu0 %vm534_vm5, %v707_v16 }
  0xe4   : > { %v409_v57 = vpop.f32.mrb[0].mxu0 }
  0xe5   : > { %v1345_v59 = vpop.f32.mrb[1].mxu0  ;;  %1346 = vmatprep.subr.mxu1 %v409_v57 }
  0xe6   : > { %1347 = vmatpush3.msra.mxu1 %v409_v57 }
  0xe7   : > { %1349 = vmatmul.mubr.msk.f32.vlgmr.msra.gmra.mrb[0].mxu1 %vm415_vm2, %v414_v58  ;;  %1520 = vmatprep.subr.bf16.mxu1 %v1519_v56  ;;  %v1262_v58 = vld [vmem:[%s1890_s6] ss:$0 sm:$0xff] }
  0xe8   : > { %1522 = vmatpush3.bf16.msra.mxu1 %v1519_v56 }
  0xe9   : > { %1524 = vmatprep.subr.bf16.mxu1 %v1523_v60 }
  0xec   : > { %1526 = vmatpush3.bf16.msra.mxu1 %v1523_v60 }
  0xed   : > { %1528 = vmatprep.subr.bf16.mxu1 %v1527_v2 }
  0xf0   : > { %1530 = vmatpush3.bf16.msra.mxu1 %v1527_v2 }
  0xf1   : > { %1532 = vmatprep.subr.bf16.mxu1 %v1531_v8 }
  0xf4   : > { %1534 = vmatpush3.bf16.msra.mxu1 %v1531_v8 }
  0xf5   : > { %1536 = vmatprep.subr.bf16.mxu1 %v1535_v15 }
 0x114   : > { %v1407_v55 = vpop.f32.mrb[2].mxu0 }
 0x115   : > { %v778_v56 = vpop.f32.mrb[3].mxu0 }
 0x1ba   : > { %v1350_v17 = vpop.f32.mrb[0].mxu1 }
 0x1bb   : > { %v792_v18 = vrot.slane %v1350_v17, 7  ;;  %v488_v19 = vpop.f32.mrb[1].mxu1 }
 0x1bc   : > { %v791_v20 = vrot.slane %v488_v19, 7 }
 0x1bd   : > { %v797_v21 = vsel %vm501_vm3, %v792_v18, 0.0 }
 0x1be   : > { %v820_v24 = vrot.slane %v797_v21, 1  ;;  %v992_v25 = vrot.slane %v797_v21, 2  ;;  %v793_v26 = vsel %vm501_vm3, %v791_v20, %v792_v18  ;;  %v796_v27 = vsel %vm501_vm3, 0.0, %v791_v20 }
 0x1bf   : > { %v817_v28 = vrot.slane %v796_v27, 1  ;;  %v818_v29 = vrot.slane %v793_v26, 1  ;;  %v989_v30 = vrot.slane %v796_v27, 2  ;;  %v990_v31 = vrot.slane %v793_v26, 2 }
 0x1c1   : > { %v819_v33 = vsel %vm528_vm4, %v817_v28, %v818_v29  ;;  %v821_v34 = vsel %vm528_vm4, %v818_v29, %v820_v24  ;;  %v991_v35 = vsel %vm702_vm6, %v989_v30, %v990_v31  ;;  %v993_v36 = vsel %vm702_vm6, %v990_v31, %v992_v25 }
 0x1c2   : > { %1424 = vmatprep.mubr.msk.f32.mxu1 %vm534_vm5, %v819_v33 }
 0x1c3   : > { %1425 = vmatmul.mubr.msk.f32.vlgmr.msra.gmra.mrb[2].mxu1 %vm534_vm5, %v821_v34 }
 0x1c4   : > { %1538 = vmatpush3.bf16.msra.mxu1 %v1535_v15  ;;  %1443 = vmatprep.mubr.msk.f32.mxu1 %vm534_vm5, %v796_v27 }
 0x1c5   : > { %1540 = vmatprep.subr.bf16.mxu1 %v1539_v32 }
 0x1c8   : > { %1542 = vmatpush3.bf16.msra.mxu1 %v1539_v32 }
 0x1c9   : > { %1544 = vmatprep.subr.bf16.mxu1 %v1543_v39 }
 0x1cc   : > { %1546 = vmatpush3.bf16.msra.mxu1 %v1543_v39 }
 0x1cd   : > { %1548 = vmatprep.subr.bf16.mxu1 %v1547_v42 }
 0x1d0   : > { %1550 = vmatpush3.bf16.msra.mxu1 %v1547_v42 }
 0x1d1   : > { %1552 = vmatprep.subr.bf16.mxu1 %v1551_v45 }
 0x1d3   : > { %1444 = vmatmul.mubr.msk.f32.vlgmr.msra.gmra.mrb[2].mxu1 %vm534_vm5, %v793_v26 }
 0x1d4   : > { %1554 = vmatpush3.bf16.msra.mxu1 %v1551_v45  ;;  %1462 = vmatprep.mubr.msk.f32.mxu1 %vm534_vm5, %v991_v35 }
 0x1d5   : > { %1556 = vmatprep.subr.bf16.mxu1 %v1555_v48 }
 0x1d8   : > { %1558 = vmatpush3.bf16.msra.mxu1 %v1555_v48 }
 0x1d9   : > { %1560 = vmatprep.subr.bf16.mxu1 %v1559_v51 }
 0x1dc   : > { %1562 = vmatpush3.bf16.msra.mxu1 %v1559_v51 }
 0x1dd   : > { %1564 = vmatprep.subr.bf16.mxu1 %v1563_v54 }
 0x1e0   : > { %1566 = vmatpush3.bf16.msra.mxu1 %v1563_v54 }
 0x1e3   : > { %1463 = vmatmul.mubr.msk.f32.vlgmr.msra.gmra.mrb[2].mxu1 %vm534_vm5, %v993_v36 }
 0x2b6   : > { %v1464_v57 = vpop.f32.mrb[2].mxu1 }
 0x2b7   : > { %v1567_v59 = vadd.f32 %v1464_v57, %v1407_v55  ;;  %v1064_v60 = vpop.f32.mrb[3].mxu1 }
 0x2b8   : > { %v1568_v61 = vadd.f32 %v1064_v60, %v778_v56 }
 0x2b9   : > { %v1085_v62 = vadd.f32 %v1567_v59, %v1262_v58 }
 0x2ba   : > { %v1084_v63 = vadd.f32 %v1568_v61, %v1262_v58 }
 0x2bb   : > { %1087 = vst [vmem:[%s329_s12 + $0x8] sm:$0xff] %v1085_v62  ;;  %v1096_v0 = vmul.f32 %v1085_v62, %v1085_v62 }
 0x2bc   : > { %1086 = vst [vmem:[%s329_s12] sm:$0xff] %v1084_v63  ;;  %v1088_v1 = vadd.f32 %v1085_v62, %v1084_v63  ;;  %v1095_v2 = vmul.f32 %v1084_v63, %v1084_v63 }
 0x2be   : > { %v1089_v3 = vrot.slane %v1088_v1, 4  ;;  %v1097_v4 = vadd.f32 %v1096_v0, %v1095_v2 }
 0x2c0   : > { %v1090_v5 = vadd.f32 %v1089_v3, %v1088_v1  ;;  %v1098_v6 = vrot.slane %v1097_v4, 4 }
 0x2c2   : > { %v1091_v7 = vrot.slane %v1090_v5, 2  ;;  %v1099_v8 = vadd.f32 %v1098_v6, %v1097_v4 }
 0x2c4   : > { %v1092_v9 = vadd.f32 %v1091_v7, %v1090_v5  ;;  %v1100_v10 = vrot.slane %v1099_v8, 2 }
 0x2c6   : > { %v1093_v11 = vrot.slane %v1092_v9, 1  ;;  %v1101_v12 = vadd.f32 %v1100_v10, %v1099_v8 }
 0x2c8   : > { %v1102_v13 = vrot.slane %v1101_v12, 1  ;;  %v1094_v14 = vadd.f32 %v1093_v11, %v1092_v9 }
 0x2ca   : > { %v1103_v15 = vadd.f32 %v1102_v13, %v1101_v12 }
 0x2cc   : > { %v1104_v16 = vsel %vm501_vm3, %v1094_v14, %v1103_v15 }
 0x2cd   : > { %1105 = vst [vmem:[%s333_s15] sm:$0x3] %v1104_v16 }
 0x2ce PF: > { %s19_s27 = sadd.s32 1, %s1594_s27  }
 0x2cf   : > { %p16_p4 = scmp.ge.s32.totalorder %s19_s27, 4  }
 0x2d1   :  { %18 = sbr.rel (!%p16_p4) target bundleno = 1 (0x1), region = 97 }

// kernel: upconv_forward.4
= control target key start
LH: loop header
LB: loop body
LE: loop exit
PB: predicated region body
PF: predicated region fallthrough
CT: control target
= control target key end

     0   :  { %s1067_s21 = smov 0   ;;  %s1262_s0 = inlined_call_operand.vmem [shape: f32[2,16,128], index: 0, kind: input, shape index: {}]   ;;  %s1263_s1 = inlined_call_operand.vmem [shape: f32[1,128], index: 1, kind: input, shape index: {}]   ;;  %s1264_s2 = inlined_call_operand.vmem [shape: f32[1,128], index: 2, kind: input, shape index: {}]   ;;  %s1265_s3 = inlined_call_operand.vmem [shape: f32[3,128,128], index: 3, kind: input, shape index: {}]   ;;  %s1266_s4 = inlined_call_operand.vmem [shape: f32[1,128], index: 4, kind: input, shape index: {}]   ;;  %s1267_s5 = inlined_call_operand.vmem [shape: f32[2,16,128], index: 5, kind: output, shape index: {0}]   ;;  %s1268_s6 = inlined_call_operand.vmem [shape: f32[2,2,128], index: 6, kind: output, shape index: {1}]  }
   0x1 LB: > { %s706_s22 = sadd.s32 4294967295, %s1030_s21   ;;  %p710_p0 = scmp.ge.s32.totalorder %s1030_s21, 1  ;;  %s1030_s21 = sphi %s1067_s21, %s17_s21  }
   0x2   : > { %p215_p1 = scmp.lt.s32.totalorder %s1030_s21, 3 }
   0x4   : > { %p216_p2 = pnand %p710_p0, %p215_p1 }
   0x5   : > { %v296_v0 = vld [vmem:[%s1265_s3] sm:$0xff] (!%p216_p2)  ;;  %v297_v1 = vld [vmem:[%s1265_s3 + $0x8] sm:$0xff] (!%p216_p2)  ;;  %v298_v2 = vld [vmem:[%s1265_s3 + $0x10] sm:$0xff] (!%p216_p2)  ;;  %p249_p3 = scmp.lt.s32.totalorder (!%p216_p2), %s706_s22, 1  ;;  %vm287_vm0 = vcmask (!%p216_p2), 1040384   ;;  %vm331_vm2 = vcmask (!%p216_p2), 1046528  }
   0x6   : > { %219 = sbr.rel (%p216_p2) target bundleno = 307 (0x133), region = 40  ;;  %v948_v3 = vpack.c.bf16 (!%p216_p2), %v297_v1, %v296_v0  ;;  %v299_v4 = vld [vmem:[%s1265_s3 + $0x18] sm:$0xff] (!%p216_p2)  ;;  %v300_v6 = vld [vmem:[%s1265_s3 + $0x20] sm:$0xff] (!%p216_p2)  ;;  %v301_v7 = vld [vmem:[%s1265_s3 + $0x28] sm:$0xff] (!%p216_p2)  ;;  %vm506_vm3 = vcmask (!%p216_p2), 1045504  }
   0x7   : > { %v952_v5 = vpack.c.bf16 (!%p216_p2), %v299_v4, %v298_v2  ;;  %v302_v8 = vld [vmem:[%s1265_s3 + $0x30] sm:$0xff] (!%p216_p2)  ;;  %v956_v9 = vpack.c.bf16 (!%p216_p2), %v301_v7, %v300_v6  ;;  %v303_v10 = vld [vmem:[%s1265_s3 + $0x38] sm:$0xff] (!%p216_p2)  ;;  %v718_v11 = vld [vmem:[%s1265_s3 + $0x80] sm:$0xff] (!%p216_p2) }
   0x8   : > { %949 = vmatprep.subr.bf16.mxu0 (!%p216_p2), %v948_v3  ;;  %v719_v12 = vld [vmem:[%s1265_s3 + $0x88] sm:$0xff] (!%p216_p2)  ;;  %v716_v16 = vld [vmem:[%s1263_s1] ss:$0 sm:$0xff] (!%p216_p2)  ;;  %v720_v20 = vld [vmem:[%s1265_s3 + $0x90] sm:$0xff] (!%p216_p2)  ;;  %v960_v22 = vpack.c.bf16 (!%p216_p2), %v303_v10, %v302_v8 }
   0x9   : > { %951 = vmatpush3.bf16.msra.mxu0 (!%p216_p2), %v948_v3  ;;  %v916_v13 = vpack.c.bf16 (!%p216_p2), %v719_v12, %v718_v11  ;;  %v717_v19 = vld [vmem:[%s1264_s2] ss:$0 sm:$0xff] (!%p216_p2)  ;;  %v721_v21 = vld [vmem:[%s1265_s3 + $0x98] sm:$0xff] (!%p216_p2)  ;;  %v305_v27 = vld [vmem:[%s1265_s3 + $0x48] sm:$0xff] (!%p216_p2) }
   0xa   : > { %953 = vmatprep.subr.bf16.mxu0 (!%p216_p2), %v952_v5  ;;  %v722_v25 = vld [vmem:[%s1265_s3 + $0xa0] sm:$0xff] (!%p216_p2)  ;;  %v920_v28 = vpack.c.bf16 (!%p216_p2), %v721_v21, %v720_v20  ;;  %v723_v29 = vld [vmem:[%s1265_s3 + $0xa8] sm:$0xff] (!%p216_p2)  ;;  %v724_v33 = vld [vmem:[%s1265_s3 + $0xb0] sm:$0xff] (!%p216_p2) }
   0xb   : > { %917 = vmatprep.subr.bf16.mxu1 (!%p216_p2), %v916_v13  ;;  %v304_v26 = vld [vmem:[%s1265_s3 + $0x40] sm:$0xff] (!%p216_p2)  ;;  %v924_v32 = vpack.c.bf16 (!%p216_p2), %v723_v29, %v722_v25  ;;  %v725_v34 = vld [vmem:[%s1265_s3 + $0xb8] sm:$0xff] (!%p216_p2)  ;;  %vm734_vm1 = vmneg (!%p216_p2), %vm287_vm0 }
   0xc   : > { %919 = vmatpush3.bf16.msra.mxu1 (!%p216_p2), %v916_v13  ;;  %v964_v35 = vpack.c.bf16 (!%p216_p2), %v305_v27, %v304_v26  ;;  %v306_v38 = vld [vmem:[%s1265_s3 + $0x50] sm:$0xff] (!%p216_p2)  ;;  %v307_v39 = vld [vmem:[%s1265_s3 + $0x58] sm:$0xff] (!%p216_p2)  ;;  %v928_v40 = vpack.c.bf16 (!%p216_p2), %v725_v34, %v724_v33  ;;  %v726_v42 = vld [vmem:[%s1265_s3 + $0xc0] sm:$0xff] (!%p216_p2) }
   0xd   : > { %s1270_s22 = smov (!%p249_p3, %s706_s22), 1  ;;  %955 = vmatpush3.bf16.msra.mxu0 %v952_v5  ;;  %921 = vmatprep.subr.bf16.mxu1 %v920_v28  ;;  %v727_v43 = vld [vmem:[%s1265_s3 + $0xc8] sm:$0xff]  ;;  %v968_v47 = vpack.c.bf16 %v307_v39, %v306_v38  ;;  %v308_v48 = vld [vmem:[%s1265_s3 + $0x60] sm:$0xff]  ;;  %v728_v52 = vld [vmem:[%s1265_s3 + $0xd0] sm:$0xff] }
   0xe   : > { %s755_s13 = sshll.u32 %s1270_s22, 4  ;;  %957 = vmatprep.subr.bf16.mxu0 %v956_v9  ;;  %v309_v49 = vld [vmem:[%s1265_s3 + $0x68] sm:$0xff]  ;;  %v932_v50 = vpack.c.bf16 %v727_v43, %v726_v42  ;;  %v729_v53 = vld [vmem:[%s1265_s3 + $0xd8] sm:$0xff]  ;;  %v310_v55 = vld [vmem:[%s1265_s3 + $0x70] sm:$0xff] }
   0xf   : > { %s253_s24 = scalar_lea.vmem %s1262_s0, %s755_s13  ;;  %v972_v54 = vpack.c.bf16 %v309_v49, %v308_v48  ;;  %v311_v56 = vld [vmem:[%s1265_s3 + $0x78] sm:$0xff]  ;;  %v936_v57 = vpack.c.bf16 %v729_v53, %v728_v52  ;;  %v730_v58 = vld [vmem:[%s1265_s3 + $0xe0] sm:$0xff]  ;;  %v731_v59 = vld [vmem:[%s1265_s3 + $0xe8] sm:$0xff]  ;;  %s258_s25 = scalar_lea.vmem %s1267_s5, %s755_s13 }
  0x10   : > { %v263_v14 = vld [vmem:[%s253_s24] sm:$0xff]  ;;  %v264_v15 = vld [vmem:[%s253_s24 + $0x8] sm:$0xff]  ;;  %923 = vmatpush3.bf16.msra.mxu1 %v920_v28  ;;  %v976_v60 = vpack.c.bf16 %v311_v56, %v310_v55  ;;  %v940_v63 = vpack.c.bf16 %v731_v59, %v730_v58  ;;  %v732_v0 = vld [vmem:[%s1265_s3 + $0xf0] sm:$0xff]  ;;  %s715_s13 = sshll.u32 %s1270_s22, 1 }
  0x11   : > { %v272_v17 = vmul.f32 %v716_v16, %v263_v14  ;;  %v273_v18 = vmul.f32 %v716_v16, %v264_v15  ;;  %959 = vmatpush3.bf16.msra.mxu0 %v956_v9  ;;  %925 = vmatprep.subr.bf16.mxu1 %v924_v32  ;;  %v736_v61 = vld [vmem:[%s1265_s3 + $0x100] sm:$0xff]  ;;  %v737_v62 = vld [vmem:[%s1265_s3 + $0x108] sm:$0xff]  ;;  %v733_v1 = vld [vmem:[%s1265_s3 + $0xf8] sm:$0xff]  ;;  %s262_s28 = scalar_lea.vmem %s1268_s6, %s715_s13 }
  0x12   : > { %961 = vmatprep.subr.bf16.mxu0 %v960_v22  ;;  %v980_v2 = vpack.c.bf16 %v737_v62, %v736_v61  ;;  %v738_v5 = vld [vmem:[%s1265_s3 + $0x110] sm:$0xff]  ;;  %v739_v6 = vld [vmem:[%s1265_s3 + $0x118] sm:$0xff]  ;;  %v944_v7 = vpack.c.bf16 %v733_v1, %v732_v0  ;;  %v740_v12 = vld [vmem:[%s1265_s3 + $0x120] sm:$0xff] }
  0x13   : > { %v281_v23 = vadd.f32 %v717_v19, %v272_v17  ;;  %v282_v24 = vadd.f32 %v717_v19, %v273_v18  ;;  %v984_v9 = vpack.c.bf16 %v739_v6, %v738_v5  ;;  %v741_v13 = vld [vmem:[%s1265_s3 + $0x128] sm:$0xff]  ;;  %v742_v16 = vld [vmem:[%s1265_s3 + $0x130] sm:$0xff]  ;;  %v743_v17 = vld [vmem:[%s1265_s3 + $0x138] sm:$0xff] }
  0x14   : > { %927 = vmatpush3.bf16.msra.mxu1 %v924_v32  ;;  %v988_v14 = vpack.c.bf16 %v741_v13, %v740_v12  ;;  %v992_v18 = vpack.c.bf16 %v743_v17, %v742_v16  ;;  %v744_v19 = vld [vmem:[%s1265_s3 + $0x140] sm:$0xff]  ;;  %v745_v20 = vld [vmem:[%s1265_s3 + $0x148] sm:$0xff]  ;;  %v750_v28 = vld [vmem:[%s1265_s3 + $0x170] sm:$0xff] }
  0x15   : > { %v283_v30 = vmax.f32 %v281_v23, 0.0  ;;  %v284_v31 = vmax.f32 %v282_v24, 0.0  ;;  %963 = vmatpush3.bf16.msra.mxu0 %v960_v22  ;;  %929 = vmatprep.subr.bf16.mxu1 %v928_v40  ;;  %v996_v21 = vpack.c.bf16 %v745_v20, %v744_v19  ;;  %v746_v22 = vld [vmem:[%s1265_s3 + $0x150] sm:$0xff]  ;;  %v747_v23 = vld [vmem:[%s1265_s3 + $0x158] sm:$0xff]  ;;  %v748_v25 = vld [vmem:[%s1265_s3 + $0x160] sm:$0xff] }
  0x16   : > { %965 = vmatprep.subr.bf16.mxu0 %v964_v35  ;;  %v1000_v24 = vpack.c.bf16 %v747_v23, %v746_v22  ;;  %v749_v26 = vld [vmem:[%s1265_s3 + $0x168] sm:$0xff]  ;;  %v751_v29 = vld [vmem:[%s1265_s3 + $0x178] sm:$0xff] }
  0x17   : > { %v288_v36 = vrot.slane %v283_v30, 7  ;;  %v289_v37 = vrot.slane %v284_v31, 7  ;;  %v1004_v27 = vpack.c.bf16 %v749_v26, %v748_v25  ;;  %v1008_v30 = vpack.c.bf16 %v751_v29, %v750_v28 }
  0x18   : > { %931 = vmatpush3.bf16.msra.mxu1 %v928_v40 }
  0x19   : > { %878 = vmatprep.mubr.msk.f32.mxu0 %vm734_vm1, %v288_v36  ;;  %v1151_v41 = vsel %vm287_vm0, %v288_v36, %v289_v37  ;;  %v294_v44 = vsel %vm287_vm0, 0.0, %v288_v36  ;;  %967 = vmatpush3.bf16.msra.mxu0 %v964_v35  ;;  %v295_v8 = vsel %vm287_vm0, %v289_v37, 0.0  ;;  %v752_v36 = vld [vmem:[%s1266_s4] ss:$0 sm:$0xff] }
  0x1a   : > { %v333_v45 = vrot.slane %v1151_v41, 1  ;;  %v332_v46 = vrot.slane %v294_v44, 1  ;;  %969 = vmatprep.subr.bf16.mxu0 %v968_v47  ;;  %933 = vmatprep.subr.bf16.mxu1 %v932_v50  ;;  %v508_v3 = vrot.slane %v1151_v41, 2  ;;  %v507_v4 = vrot.slane %v294_v44, 2 }
  0x1b   : > { %v335_v10 = vrot.slane %v295_v8, 1  ;;  %v510_v31 = vrot.slane %v295_v8, 2 }
  0x1c   : > { %v334_v51 = vsel %vm331_vm2, %v332_v46, %v333_v45  ;;  %935 = vmatpush3.bf16.msra.mxu1 %v932_v50  ;;  %v509_v11 = vsel %vm506_vm3, %v507_v4, %v508_v3 }
  0x1d   : > { %843 = vmatprep.mubr.f32.mxu1 %v334_v51  ;;  %971 = vmatpush3.bf16.msra.mxu0 %v968_v47  ;;  %v336_v15 = vsel %vm331_vm2, %v333_v45, %v335_v10  ;;  %v511_v32 = vsel %vm506_vm3, %v508_v3, %v510_v31 }
  0x1e   : > { %973 = vmatprep.subr.bf16.mxu0 %v972_v54  ;;  %937 = vmatprep.subr.bf16.mxu1 %v936_v57 }
  0x20   : > { %939 = vmatpush3.bf16.msra.mxu1 %v936_v57 }
  0x21   : > { %975 = vmatpush3.bf16.msra.mxu0 %v972_v54  ;;  %941 = vmatprep.subr.bf16.mxu1 %v940_v63 }
  0x22   : > { %977 = vmatprep.subr.bf16.mxu0 %v976_v60 }
  0x24   : > { %943 = vmatpush3.bf16.msra.mxu1 %v940_v63 }
  0x25   : > { %979 = vmatpush3.bf16.msra.mxu0 %v976_v60  ;;  %945 = vmatprep.subr.bf16.mxu1 %v944_v7 }
  0x26   : > { %981 = vmatprep.subr.bf16.mxu0 %v980_v2 }
  0x28   : > { %879 = vmatmul.mubr.f32.vlgmr.msra.gmra.mrb[0].mxu0 %v1151_v41  ;;  %947 = vmatpush3.bf16.msra.mxu1 %v944_v7 }
  0x29   : > { %983 = vmatpush3.bf16.msra.mxu0 %v980_v2  ;;  %913 = vmatprep.mubr.f32.mxu0 %v509_v11 }
  0x2a   : > { %985 = vmatprep.subr.bf16.mxu0 %v984_v9 }
  0x2b   : > { %844 = vmatmul.mubr.f32.vlgmr.msra.gmra.mrb[0].mxu1 %v336_v15 }
  0x2d   : > { %987 = vmatpush3.bf16.msra.mxu0 %v984_v9 }
  0x2e   : > { %989 = vmatprep.subr.bf16.mxu0 %v988_v14 }
  0x31   : > { %991 = vmatpush3.bf16.msra.mxu0 %v988_v14 }
  0x32   : > { %993 = vmatprep.subr.bf16.mxu0 %v992_v18 }
  0x35   : > { %995 = vmatpush3.bf16.msra.mxu0 %v992_v18 }
  0x36   : > { %997 = vmatprep.subr.bf16.mxu0 %v996_v21 }
  0x39   : > { %999 = vmatpush3.bf16.msra.mxu0 %v996_v21 }
  0x3a   : > { %1001 = vmatprep.subr.bf16.mxu0 %v1000_v24 }
  0x3d   : > { %1003 = vmatpush3.bf16.msra.mxu0 %v1000_v24 }
  0x3e   : > { %1005 = vmatprep.subr.bf16.mxu0 %v1004_v27 }
  0x41   : > { %1007 = vmatpush3.bf16.msra.mxu0 %v1004_v27 }
  0x42   : > { %1009 = vmatprep.subr.bf16.mxu0 %v1008_v30 }
  0x45   : > { %1011 = vmatpush3.bf16.msra.mxu0 %v1008_v30 }
  0x48   : > { %914 = vmatmul.mubr.f32.vlgmr.msra.gmra.mrb[0].mxu0 %v511_v32 }
  0xfe   : > { %v845_v33 = vpop.f32.mrb[0].mxu1 }
  0xff   : > { %v405_v34 = vpop.f32.mrb[1].mxu1 }
 0x11b   : > { %v915_v35 = vpop.f32.mrb[0].mxu0 }
 0x11c   : > { %v1012_v37 = vadd.f32 %v915_v35, %v845_v33  ;;  %v580_v38 = vpop.f32.mrb[1].mxu0 }
 0x11d   : > { %v1013_v39 = vadd.f32 %v580_v38, %v405_v34 }
 0x11e   : > { %v599_v40 = vadd.f32 %v1012_v37, %v752_v36 }
 0x11f   : > { %v598_v41 = vadd.f32 %v1013_v39, %v752_v36 }
 0x120   : > { %601 = vst [vmem:[%s258_s25 + $0x8] sm:$0xff] %v599_v40  ;;  %v610_v42 = vmul.f32 %v599_v40, %v599_v40 }
 0x121   : > { %600 = vst [vmem:[%s258_s25] sm:$0xff] %v598_v41  ;;  %v602_v43 = vadd.f32 %v599_v40, %v598_v41  ;;  %v609_v44 = vmul.f32 %v598_v41, %v598_v41 }
 0x123   : > { %v603_v45 = vrot.slane %v602_v43, 4  ;;  %v611_v46 = vadd.f32 %v610_v42, %v609_v44 }
 0x125   : > { %v604_v47 = vadd.f32 %v603_v45, %v602_v43  ;;  %v612_v48 = vrot.slane %v611_v46, 4 }
 0x127   : > { %v605_v49 = vrot.slane %v604_v47, 2  ;;  %v613_v50 = vadd.f32 %v612_v48, %v611_v46 }
 0x129   : > { %v606_v51 = vadd.f32 %v605_v49, %v604_v47  ;;  %v614_v52 = vrot.slane %v613_v50, 2 }
 0x12b   : > { %v607_v53 = vrot.slane %v606_v51, 1  ;;  %v615_v54 = vadd.f32 %v614_v52, %v613_v50 }
 0x12d   : > { %v616_v55 = vrot.slane %v615_v54, 1  ;;  %v608_v56 = vadd.f32 %v607_v53, %v606_v51 }
 0x12f   : > { %v617_v57 = vadd.f32 %v616_v55, %v615_v54 }
 0x131   : > { %v618_v58 = vsel %vm287_vm0, %v608_v56, %v617_v57 }
 0x132   : > { %619 = vst [vmem:[%s262_s28] sm:$0x3] %v618_v58 }
 0x133 PF: > { %s17_s21 = sadd.s32 1, %s1030_s21  }
 0x134   : > { %p14_p4 = scmp.ge.s32.totalorder %s17_s21, 4  }
 0x136   :  { %16 = sbr.rel (!%p14_p4) target bundleno = 1 (0x1), region = 84 }

// kernel: upconv_forward.5
= control target key start
LH: loop header
LB: loop body
LE: loop exit
PB: predicated region body
PF: predicated region fallthrough
CT: control target
= control target key end

     0   :  { %s301_s12 = smov 0   ;;  %s318_s0 = inlined_call_operand.vmem [shape: f32[2,16,128], index: 0, kind: input, shape index: {}]   ;;  %s319_s1 = inlined_call_operand.vmem [shape: f32[1,128], index: 1, kind: input, shape index: {}]   ;;  %s320_s2 = inlined_call_operand.vmem [shape: f32[1,128], index: 2, kind: input, shape index: {}]   ;;  %s321_s3 = inlined_call_operand.vmem [shape: f32[2,16,128], index: 3, kind: output, shape index: {}]  }
   0x1 LB: > { %s250_s13 = sadd.s32 4294967295, %s279_s12   ;;  %p254_p0 = scmp.ge.s32.totalorder %s279_s12, 1  ;;  %s279_s12 = sphi %s301_s12, %s13_s12  }
   0x2   : > { %p137_p1 = scmp.lt.s32.totalorder %s279_s12, 3 }
   0x4   : > { %p138_p2 = pnand %p254_p0, %p137_p1 }
   0x5   : > { %p161_p3 = scmp.lt.s32.totalorder (!%p138_p2), %s250_s13, 1  ;;  %v259_v0 = vld [vmem:[%s319_s1] ss:$0 sm:$0xff] (!%p138_p2) }
   0x6   : > { %141 = sbr.rel (%p138_p2) target bundleno = 24 (0x18), region = 32  ;;  %v260_v3 = vld [vmem:[%s320_s2] ss:$0 sm:$0xff] (!%p138_p2) }
   0xd   : > { %s323_s13 = smov (!%p161_p3, %s250_s13), 1 }
   0xe   : > { %s263_s14 = sshll.u32 %s323_s13, 4 }
   0xf   : > { %s165_s19 = scalar_lea.vmem %s318_s0, %s263_s14  ;;  %s170_s24 = scalar_lea.vmem %s321_s3, %s263_s14 }
  0x10   : > { %v171_v1 = vld [vmem:[%s165_s19] sm:$0xff]  ;;  %v172_v2 = vld [vmem:[%s165_s19 + $0x8] sm:$0xff] }
  0x11   : > { %v180_v4 = vmul.f32 %v259_v0, %v171_v1  ;;  %v181_v5 = vmul.f32 %v259_v0, %v172_v2 }
  0x13   : > { %v189_v6 = vadd.f32 %v260_v3, %v180_v4  ;;  %v190_v7 = vadd.f32 %v260_v3, %v181_v5 }
  0x15   : > { %v191_v8 = vmax.f32 %v189_v6, 0.0  ;;  %v192_v9 = vmax.f32 %v190_v7, 0.0 }
  0x17   : > { %193 = vst [vmem:[%s170_s24] sm:$0xff] %v191_v8  ;;  %194 = vst [vmem:[%s170_s24 + $0x8] sm:$0xff] %v192_v9 }
  0x18 PF: > { %s13_s12 = sadd.s32 1, %s279_s12  }
  0x19   : > { %p10_p4 = scmp.ge.s32.totalorder %s13_s12, 4  }
  0x1b   :  { %12 = sbr.rel (!%p10_p4) target bundleno = 1 (0x1), region = 62 }

</bundles_post_ra>
